<compile_context>
chip_gen: v7x
topology: tpu7x:2x2x1
jax: 0.10.0
libtpu: 0.0.40
codegen_flags: <defaults>
</compile_context>

<pallas_src>
import functools

import jax
import jax.numpy as jnp
from jax import lax
from jax.experimental import pallas as pl
from jax.experimental.pallas import tpu as pltpu

NUM_LAYERS = 2
NUM_DIRS = 2

# Raised scoped-VMEM budget: above the 16/32 MiB defaults (v5e/v6e) so larger
# time blocks + weights can stay resident, below v7x's 64 MiB physical.
_VMEM_LIMIT = 48 * 1024 * 1024


# ----------------------------------------------------------------------------
# Pallas kernels
# ----------------------------------------------------------------------------
def _linear_kernel(x_ref, w_ref, b_ref, o_ref):
    # w is pre-transposed to (Din, Dout): MXU consumes it in natural (K, N)
    # layout, no in-kernel transpose.
    o_ref[...] = (jnp.dot(x_ref[...], w_ref[...],
                          preferred_element_type=jnp.float32)
                  + b_ref[...])


def _lstm_rec_kernel(gx_ref, whh_ref, h0_ref, c0_ref,
                     y_ref, hn_ref, cn_ref, h_sc, c_sc,
                     *, tt, hidden, reverse):
    """One time-block (tt steps) of a single-direction LSTM recurrence.

    gx_ref : (tt, B, 4H) precomputed x-projection (+ bias) for this block.
    whh_ref: (H, 4H) pre-transposed recurrent weight (resident).
    y_ref  : (tt, B, H) output block.  h/c scratch persist across grid steps.
    """
    blk = pl.program_id(0)

    @pl.when(blk == 0)
    def _():
        h_sc[...] = h0_ref[...]
        c_sc[...] = c0_ref[...]

    whh = whh_ref[...]                       # hoisted: loaded once per block

    def step(i, carry):
        h, c = carry
        # Static `reverse` flag: backward direction walks the block in reverse
        # so the output is written directly in original time order.
        t = (tt - 1 - i) if reverse else i
        gates = gx_ref[t] + jnp.dot(h, whh,
                                    preferred_element_type=jnp.float32)
        i_g = jax.nn.sigmoid(gates[:, 0 * hidden:1 * hidden])
        f_g = jax.nn.sigmoid(gates[:, 1 * hidden:2 * hidden])
        g_g = jnp.tanh(gates[:, 2 * hidden:3 * hidden])
        o_g = jax.nn.sigmoid(gates[:, 3 * hidden:4 * hidden])
        c_new = f_g * c + i_g * g_g
        h_new = o_g * jnp.tanh(c_new)
        y_ref[t] = h_new
        return h_new, c_new

    h, c = lax.fori_loop(0, tt, step, (h_sc[...], c_sc[...]), unroll=True)
    h_sc[...] = h
    c_sc[...] = c

    # Final states only need to be written once, on the last time block.
    @pl.when(blk == pl.num_programs(0) - 1)
    def _():
        hn_ref[...] = h
        cn_ref[...] = c


# ----------------------------------------------------------------------------
# Wrappers
# ----------------------------------------------------------------------------
def linear_pallas(x, w_t, b, *, row_block=256):
    """x: (N, Din) @ w_t: (Din, Dout) + b: (1, Dout) -> (N, Dout), row-tiled."""
    N, Din = x.shape
    Dout = w_t.shape[1]
    tn = min(row_block, N)
    return pl.pallas_call(
        _linear_kernel,
        out_shape=jax.ShapeDtypeStruct((N, Dout), jnp.float32),
        grid_spec=pltpu.PrefetchScalarGridSpec(
            num_scalar_prefetch=0,
            grid=(pl.cdiv(N, tn),),
            in_specs=[
                pl.BlockSpec((tn, Din), lambda i: (i, 0)),
                pl.BlockSpec((Din, Dout), lambda i: (0, 0)),
                pl.BlockSpec((1, Dout), lambda i: (0, 0)),
            ],
            out_specs=pl.BlockSpec((tn, Dout), lambda i: (i, 0)),
        ),
        compiler_params=pltpu.CompilerParams(
            dimension_semantics=("parallel",),
            vmem_limit_bytes=_VMEM_LIMIT),
    )(x, w_t, b)


def lstm_recurrence_pallas(gx, whh_t, h0, c0, *, reverse, gate_col=0,
                           time_block=32):
    """Run the serial part of one LSTM direction over the whole sequence.

    gx    : (T, B, n_dir*4H) precomputed x-projections (+bias); `gate_col`
            selects this direction's (tt, B, 4H) column block via the BlockSpec.
    whh_t : (H, 4H) pre-transposed recurrent weight.
    Returns y: (T, B, H), h_n: (B, H), c_n: (B, H).
    """
    T, B, _ = gx.shape
    H = whh_t.shape[0]
    G = 4 * H

    # Largest divisor of T not exceeding time_block (avoids ragged last block).
    tt = min(time_block, T)
    while T % tt:
        tt -= 1
    nb = T // tt

    # Sequence reversal expressed in the index map (no jnp.flip HBM copies).
    t_map = (lambda b: nb - 1 - b) if reverse else (lambda b: b)

    kernel = functools.partial(_lstm_rec_kernel, tt=tt, hidden=H,
                               reverse=reverse)

    return pl.pallas_call(
        kernel,
        out_shape=(jax.ShapeDtypeStruct((T, B, H), jnp.float32),
                   jax.ShapeDtypeStruct((B, H), jnp.float32),
                   jax.ShapeDtypeStruct((B, H), jnp.float32)),
        grid_spec=pltpu.PrefetchScalarGridSpec(
            num_scalar_prefetch=0,
            grid=(nb,),
            in_specs=[
                pl.BlockSpec((tt, B, G), lambda b: (t_map(b), 0, gate_col)),
                pl.BlockSpec((H, G), lambda b: (0, 0)),
                pl.BlockSpec((B, H), lambda b: (0, 0)),
                pl.BlockSpec((B, H), lambda b: (0, 0)),
            ],
            out_specs=[
                pl.BlockSpec((tt, B, H), lambda b: (t_map(b), 0, 0)),
                pl.BlockSpec((B, H), lambda b: (0, 0)),
                pl.BlockSpec((B, H), lambda b: (0, 0)),
            ],
            scratch_shapes=[pltpu.VMEM((B, H), jnp.float32),
                            pltpu.VMEM((B, H), jnp.float32)],
        ),
        compiler_params=pltpu.CompilerParams(
            dimension_semantics=("arbitrary",),
            vmem_limit_bytes=_VMEM_LIMIT),
    )(gx, whh_t, h0, c0)


# ----------------------------------------------------------------------------
# BLSTM forward (bi=True, layers=2) — PyTorch semantics
# ----------------------------------------------------------------------------
@jax.jit
def blstm_forward(x, params, hidden=None):
    """Returns (out (T,B,D), (h_n (4,B,D), c_n (4,B,D)))."""
    T, B, D = x.shape
    h_list, c_list = [], []
    inp = x
    for layer in range(NUM_LAYERS):
        d_in = inp.shape[-1]
        pf = params[f"l{layer}_d0"]
        pb = params[f"l{layer}_d1"]
        # Hoisted input projection for BOTH directions of this layer:
        # one big (T*B, d_in) @ (d_in, 8D) matmul, bias folded in.
        wih_cat = jnp.concatenate([pf[0].T, pb[0].T], axis=1)       # (d_in, 8D)
        b_cat = jnp.concatenate([pf[2] + pf[3], pb[2] + pb[3]]).reshape(1, -1)
        gx = linear_pallas(inp.reshape(T * B, d_in), wih_cat,
                           b_cat).reshape(T, B, NUM_DIRS * 4 * D)

        dir_outs = []
        for direction in range(NUM_DIRS):
            w_hh = params[f"l{layer}_d{direction}"][1]
            idx = layer * NUM_DIRS + direction
            if hidden is None:
                h0 = jnp.zeros((B, D), jnp.float32)
                c0 = jnp.zeros((B, D), jnp.float32)
            else:
                h0 = hidden[0][idx]
                c0 = hidden[1][idx]
            y, hn, cn = lstm_recurrence_pallas(
                gx, w_hh.T, h0, c0,
                reverse=(direction == 1), gate_col=direction)
            dir_outs.append(y)
            h_list.append(hn)
            c_list.append(cn)
        inp = jnp.concatenate(dir_outs, axis=-1)                    # (T, B, 2D)

    w_lin, b_lin = params["linear"]
    out = linear_pallas(inp.reshape(T * B, 2 * D), w_lin.T,
                        b_lin.reshape(1, -1)).reshape(T, B, D)
    h_n = jnp.stack(h_list, axis=0)                                 # (4, B, D)
    c_n = jnp.stack(c_list, axis=0)
    return out, (h_n, c_n)


# ----------------------------------------------------------------------------
# Pure-JAX reference (for correctness check)
# ----------------------------------------------------------------------------
def _ref_lstm_layer(x, w_ih, w_hh, b_ih, b_hh, h0, c0):
    H = h0.shape[-1]

    def step(carry, x_t):
        h, c = carry
        gates = x_t @ w_ih.T + h @ w_hh.T + b_ih + b_hh
        i = jax.nn.sigmoid(gates[:, :H])
        f = jax.nn.sigmoid(gates[:, H:2 * H])
        g = jnp.tanh(gates[:, 2 * H:3 * H])
        o = jax.nn.sigmoid(gates[:, 3 * H:])
        c = f * c + i * g
        h = o * jnp.tanh(c)
        return (h, c), h

    (hn, cn), ys = lax.scan(step, (h0, c0), x)
    return ys, hn, cn


def blstm_reference(x, params):
    T, B, D = x.shape
    h_list, c_list = [], []
    inp = x
    for layer in range(NUM_LAYERS):
        dir_outs = []
        for direction in range(NUM_DIRS):
            w_ih, w_hh, b_ih, b_hh = params[f"l{layer}_d{direction}"]
            h0 = jnp.zeros((B, D), jnp.float32)
            c0 = jnp.zeros((B, D), jnp.float32)
            xi = inp if direction == 0 else jnp.flip(inp, axis=0)
            y, hn, cn = _ref_lstm_layer(xi, w_ih, w_hh, b_ih, b_hh, h0, c0)
            if direction == 1:
                y = jnp.flip(y, axis=0)
            dir_outs.append(y)
            h_list.append(hn)
            c_list.append(cn)
        inp = jnp.concatenate(dir_outs, axis=-1)
    w_lin, b_lin = params["linear"]
    out = inp @ w_lin.T + b_lin
    return out, (jnp.stack(h_list, 0), jnp.stack(c_list, 0))


# ----------------------------------------------------------------------------
# Deterministic parameter init (PyTorch-style uniform(-1/sqrt(H), 1/sqrt(H)))
# ----------------------------------------------------------------------------
def init_params(key, dim):
    params = {}
    k_lstm = 1.0 / jnp.sqrt(dim)
    for layer in range(NUM_LAYERS):
        d_in = dim if layer == 0 else 2 * dim
        for direction in range(NUM_DIRS):
            key, k1, k2, k3, k4 = jax.random.split(key, 5)
            w_ih = jax.random.uniform(k1, (4 * dim, d_in), jnp.float32,
                                      -k_lstm, k_lstm)
            w_hh = jax.random.uniform(k2, (4 * dim, dim), jnp.float32,
                                      -k_lstm, k_lstm)
            b_ih = jax.random.uniform(k3, (4 * dim,), jnp.float32,
                                      -k_lstm, k_lstm)
            b_hh = jax.random.uniform(k4, (4 * dim,), jnp.float32,
                                      -k_lstm, k_lstm)
            params[f"l{layer}_d{direction}"] = (w_ih, w_hh, b_ih, b_hh)
    key, k1, k2 = jax.random.split(key, 3)
    k_lin = 1.0 / jnp.sqrt(2 * dim)
    w_lin = jax.random.uniform(k1, (dim, 2 * dim), jnp.float32, -k_lin, k_lin)
    b_lin = jax.random.uniform(k2, (dim,), jnp.float32, -k_lin, k_lin)
    params["linear"] = (w_lin, b_lin)
    return params


# ----------------------------------------------------------------------------
if __name__ == "__main__":
    DIM = 32     # hidden/input size of the BLSTM
    T = 8        # sequence length
    B = 2        # batch

    key = jax.random.PRNGKey(0)
    key, kx, kp = jax.random.split(key, 3)
    x = jax.random.normal(kx, (T, B, DIM), jnp.float32)
    params = init_params(kp, DIM)

    out, (h_n, c_n) = blstm_forward(x, params)
    jax.block_until_ready((out, h_n, c_n))

    # Sanity check against the pure-JAX reference.
    ref_out, (ref_h, ref_c) = blstm_reference(x, params)
    assert out.shape == (T, B, DIM)
    assert h_n.shape == (NUM_LAYERS * NUM_DIRS, B, DIM)
    assert c_n.shape == (NUM_LAYERS * NUM_DIRS, B, DIM)
    assert jnp.allclose(out, ref_out, atol=1e-5, rtol=1e-5)
    assert jnp.allclose(h_n, ref_h, atol=1e-5, rtol=1e-5)
    assert jnp.allclose(c_n, ref_c, atol=1e-5, rtol=1e-5)

    print("KERNEL_OK")
</pallas_src>

<mosaic_0001>
module attributes {stable_mosaic.version = 11 : i64} {
  func.func @_linear_kernel(%arg0: i32, %arg1: memref<16x32xf32, #tpu.memory_space<vmem>>, %arg2: memref<32x256xf32, #tpu.memory_space<vmem>>, %arg3: memref<1x256xf32, #tpu.memory_space<vmem>>, %arg4: memref<16x256xf32, #tpu.memory_space<vmem>>) attributes {dimension_semantics = [#tpu.dimension_semantics<parallel>], iteration_bounds = array<i64: 1>, scalar_prefetch = 0 : i64, scratch_operands = 0 : i64, tpu.core_type = #tpu.core_type<tc>, window_params = [{transform_indices = @transform_0, window_bounds = array<i64: 16, 32>}, {pipeline_mode = #tpu.pipeline_mode<synchronous>, transform_indices = @transform_1, window_bounds = array<i64: 32, 256>}, {pipeline_mode = #tpu.pipeline_mode<synchronous>, transform_indices = @transform_2, window_bounds = array<i64: 1, 256>}, {transform_indices = @transform_3, window_bounds = array<i64: 16, 256>}]} {
    %c0 = arith.constant 0 : index
    %c0_0 = arith.constant 0 : index
    %0 = vector.load %arg1[%c0, %c0_0] : memref<16x32xf32, #tpu.memory_space<vmem>>, vector<16x32xf32>
    %c0_1 = arith.constant 0 : index
    %c0_2 = arith.constant 0 : index
    %1 = vector.load %arg2[%c0_1, %c0_2] : memref<32x256xf32, #tpu.memory_space<vmem>>, vector<32x256xf32>
    %cst = arith.constant dense<0.000000e+00> : vector<16x256xf32>
    %2 = tpu.matmul %0, %1, %cst {dimension_numbers = #tpu.dot_dimension_numbers<[1], [0], [0], [1], [0, 0, 1, 1], [], []>} : vector<16x32xf32>, vector<32x256xf32>, vector<16x256xf32> -> vector<16x256xf32>
    %c0_3 = arith.constant 0 : index
    %c0_4 = arith.constant 0 : index
    %3 = vector.load %arg3[%c0_3, %c0_4] : memref<1x256xf32, #tpu.memory_space<vmem>>, vector<1x256xf32>
    %4 = vector.broadcast %3 : vector<1x256xf32> to vector<16x256xf32>
    %5 = arith.addf %2, %4 : vector<16x256xf32>
    %c0_5 = arith.constant 0 : index
    %c0_6 = arith.constant 0 : index
    %6 = vector.load %arg4[%c0_5, %c0_6] : memref<16x256xf32, #tpu.memory_space<vmem>>, vector<16x256xf32>
    tpu.vector_store %arg4[%c0_5, %c0_6], %5 {strides = array<i32>} : memref<16x256xf32, #tpu.memory_space<vmem>>, vector<16x256xf32>,
    return
  }
  func.func @transform_0(%arg0: i32) -> (i32, i32) {
    %c0_i32 = arith.constant 0 : i32
    %c0_i32_0 = arith.constant 0 : i32
    return %arg0, %c0_i32 : i32, i32
  }
  func.func @transform_1(%arg0: i32) -> (i32, i32) {
    %c0_i32 = arith.constant 0 : i32
    %c0_i32_0 = arith.constant 0 : i32
    %c0_i32_1 = arith.constant 0 : i32
    return %c0_i32, %c0_i32_0 : i32, i32
  }
  func.func @transform_2(%arg0: i32) -> (i32, i32) {
    %c0_i32 = arith.constant 0 : i32
    %c0_i32_0 = arith.constant 0 : i32
    %c0_i32_1 = arith.constant 0 : i32
    return %c0_i32, %c0_i32_0 : i32, i32
  }
  func.func @transform_3(%arg0: i32) -> (i32, i32) {
    %c0_i32 = arith.constant 0 : i32
    %c0_i32_0 = arith.constant 0 : i32
    return %arg0, %c0_i32 : i32, i32
  }
}

module attributes {stable_mosaic.version = 11 : i64} {
  func.func @_lstm_rec_kernel(%arg0: i32, %arg1: memref<8x2x128xf32, #tpu.memory_space<vmem>>, %arg2: memref<32x128xf32, #tpu.memory_space<vmem>>, %arg3: memref<2x32xf32, #tpu.memory_space<vmem>>, %arg4: memref<2x32xf32, #tpu.memory_space<vmem>>, %arg5: memref<8x2x32xf32, #tpu.memory_space<vmem>>, %arg6: memref<2x32xf32, #tpu.memory_space<vmem>>, %arg7: memref<2x32xf32, #tpu.memory_space<vmem>>, %arg8: memref<2x32xf32, #tpu.memory_space<vmem>>, %arg9: memref<2x32xf32, #tpu.memory_space<vmem>>) attributes {dimension_semantics = [#tpu.dimension_semantics<arbitrary>], iteration_bounds = array<i64: 1>, scalar_prefetch = 0 : i64, scratch_operands = 2 : i64, tpu.core_type = #tpu.core_type<tc>, window_params = [{transform_indices = @transform_0, window_bounds = array<i64: 8, 2, 128>}, {pipeline_mode = #tpu.pipeline_mode<synchronous>, transform_indices = @transform_1, window_bounds = array<i64: 32, 128>}, {pipeline_mode = #tpu.pipeline_mode<synchronous>, transform_indices = @transform_2, window_bounds = array<i64: 2, 32>}, {pipeline_mode = #tpu.pipeline_mode<synchronous>, transform_indices = @transform_3, window_bounds = array<i64: 2, 32>}, {transform_indices = @transform_4, window_bounds = array<i64: 8, 2, 32>}, {pipeline_mode = #tpu.pipeline_mode<synchronous>, transform_indices = @transform_5, window_bounds = array<i64: 2, 32>}, {pipeline_mode = #tpu.pipeline_mode<synchronous>, transform_indices = @transform_6, window_bounds = array<i64: 2, 32>}]} {
    %c0_i32 = arith.constant 0 : i32
    %0 = arith.cmpi eq, %arg0, %c0_i32 : i32
    %1 = arith.extui %0 : i1 to i32
    %c0_i32_0 = arith.constant 0 : i32
    %2 = arith.cmpi ne, %1, %c0_i32_0 : i32
    scf.if %2 {
      %c0_84 = arith.constant 0 : index
      %c0_85 = arith.constant 0 : index
      %291 = vector.load %arg3[%c0_84, %c0_85] : memref<2x32xf32, #tpu.memory_space<vmem>>, vector<2x32xf32>
      %c0_86 = arith.constant 0 : index
      %c0_87 = arith.constant 0 : index
      %292 = vector.load %arg8[%c0_86, %c0_87] : memref<2x32xf32, #tpu.memory_space<vmem>>, vector<2x32xf32>
      tpu.vector_store %arg8[%c0_86, %c0_87], %291 {strides = array<i32>} : memref<2x32xf32, #tpu.memory_space<vmem>>, vector<2x32xf32>,
      %c0_88 = arith.constant 0 : index
      %c0_89 = arith.constant 0 : index
      %293 = vector.load %arg4[%c0_88, %c0_89] : memref<2x32xf32, #tpu.memory_space<vmem>>, vector<2x32xf32>
      %c0_90 = arith.constant 0 : index
      %c0_91 = arith.constant 0 : index
      %294 = vector.load %arg9[%c0_90, %c0_91] : memref<2x32xf32, #tpu.memory_space<vmem>>, vector<2x32xf32>
      tpu.vector_store %arg9[%c0_90, %c0_91], %293 {strides = array<i32>} : memref<2x32xf32, #tpu.memory_space<vmem>>, vector<2x32xf32>,
    } else {
    }
    %c0 = arith.constant 0 : index
    %c0_1 = arith.constant 0 : index
    %3 = vector.load %arg2[%c0, %c0_1] : memref<32x128xf32, #tpu.memory_space<vmem>>, vector<32x128xf32>
    %c0_2 = arith.constant 0 : index
    %c0_3 = arith.constant 0 : index
    %4 = vector.load %arg8[%c0_2, %c0_3] : memref<2x32xf32, #tpu.memory_space<vmem>>, vector<2x32xf32>
    %c0_4 = arith.constant 0 : index
    %c0_5 = arith.constant 0 : index
    %5 = vector.load %arg9[%c0_4, %c0_5] : memref<2x32xf32, #tpu.memory_space<vmem>>, vector<2x32xf32>
    %c0_i32_6 = arith.constant 0 : i32
    %c7_i32 = arith.constant 7 : i32
    %6 = arith.subi %c7_i32, %c0_i32_6 : i32
    %7 = arith.index_cast %6 : i32 to index
    %c0_7 = arith.constant 0 : index
    %c0_8 = arith.constant 0 : index
    %8 = vector.load %arg1[%7, %c0_7, %c0_8] : memref<8x2x128xf32, #tpu.memory_space<vmem>>, vector<1x2x128xf32>
    %9 = vector.shape_cast %8 : vector<1x2x128xf32> to vector<2x128xf32>
    %cst = arith.constant dense<0.000000e+00> : vector<2x128xf32>
    %10 = tpu.matmul %4, %3, %cst {dimension_numbers = #tpu.dot_dimension_numbers<[1], [0], [0], [1], [0, 0, 1, 1], [], []>} : vector<2x32xf32>, vector<32x128xf32>, vector<2x128xf32> -> vector<2x128xf32>
    %11 = arith.addf %9, %10 : vector<2x128xf32>
    %12 = vector.extract_strided_slice %11 {offsets = [0, 0], sizes = [2, 32], strides = [1, 1]} : vector<2x128xf32> to vector<2x32xf32>
    %13 = arith.negf %12 : vector<2x32xf32>
    %14 = math.exp %13 : vector<2x32xf32>
    %cst_9 = arith.constant 1.000000e+00 : f32
    %15 = vector.broadcast %cst_9 : f32 to vector<2x32xf32>
    %16 = arith.addf %15, %14 : vector<2x32xf32>
    %17 = arith.divf %15, %16 : vector<2x32xf32>
    %18 = vector.extract_strided_slice %11 {offsets = [0, 32], sizes = [2, 32], strides = [1, 1]} : vector<2x128xf32> to vector<2x32xf32>
    %19 = arith.negf %18 : vector<2x32xf32>
    %20 = math.exp %19 : vector<2x32xf32>
    %cst_10 = arith.constant 1.000000e+00 : f32
    %21 = vector.broadcast %cst_10 : f32 to vector<2x32xf32>
    %22 = arith.addf %21, %20 : vector<2x32xf32>
    %23 = arith.divf %21, %22 : vector<2x32xf32>
    %24 = vector.extract_strided_slice %11 {offsets = [0, 64], sizes = [2, 32], strides = [1, 1]} : vector<2x128xf32> to vector<2x32xf32>
    %25 = math.tanh %24 : vector<2x32xf32>
    %26 = vector.extract_strided_slice %11 {offsets = [0, 96], sizes = [2, 32], strides = [1, 1]} : vector<2x128xf32> to vector<2x32xf32>
    %27 = arith.negf %26 : vector<2x32xf32>
    %28 = math.exp %27 : vector<2x32xf32>
    %cst_11 = arith.constant 1.000000e+00 : f32
    %29 = vector.broadcast %cst_11 : f32 to vector<2x32xf32>
    %30 = arith.addf %29, %28 : vector<2x32xf32>
    %31 = arith.divf %29, %30 : vector<2x32xf32>
    %32 = arith.mulf %23, %5 : vector<2x32xf32>
    %33 = arith.mulf %17, %25 : vector<2x32xf32>
    %34 = arith.addf %32, %33 : vector<2x32xf32>
    %35 = math.tanh %34 : vector<2x32xf32>
    %36 = arith.mulf %31, %35 : vector<2x32xf32>
    %37 = arith.index_cast %6 : i32 to index
    %c0_12 = arith.constant 0 : index
    %c0_13 = arith.constant 0 : index
    %38 = vector.load %arg5[%37, %c0_12, %c0_13] : memref<8x2x32xf32, #tpu.memory_space<vmem>>, vector<1x2x32xf32>
    %39 = vector.shape_cast %38 : vector<1x2x32xf32> to vector<2x32xf32>
    %40 = vector.shape_cast %36 : vector<2x32xf32> to vector<1x2x32xf32>
    tpu.vector_store %arg5[%37, %c0_12, %c0_13], %40 {strides = array<i32>} : memref<8x2x32xf32, #tpu.memory_space<vmem>>, vector<1x2x32xf32>,
    %c1_i32 = arith.constant 1 : i32
    %c7_i32_14 = arith.constant 7 : i32
    %41 = arith.subi %c7_i32_14, %c1_i32 : i32
    %42 = arith.index_cast %41 : i32 to index
    %c0_15 = arith.constant 0 : index
    %c0_16 = arith.constant 0 : index
    %43 = vector.load %arg1[%42, %c0_15, %c0_16] : memref<8x2x128xf32, #tpu.memory_space<vmem>>, vector<1x2x128xf32>
    %44 = vector.shape_cast %43 : vector<1x2x128xf32> to vector<2x128xf32>
    %cst_17 = arith.constant dense<0.000000e+00> : vector<2x128xf32>
    %45 = tpu.matmul %36, %3, %cst_17 {dimension_numbers = #tpu.dot_dimension_numbers<[1], [0], [0], [1], [0, 0, 1, 1], [], []>} : vector<2x32xf32>, vector<32x128xf32>, vector<2x128xf32> -> vector<2x128xf32>
    %46 = arith.addf %44, %45 : vector<2x128xf32>
    %47 = vector.extract_strided_slice %46 {offsets = [0, 0], sizes = [2, 32], strides = [1, 1]} : vector<2x128xf32> to vector<2x32xf32>
    %48 = arith.negf %47 : vector<2x32xf32>
    %49 = math.exp %48 : vector<2x32xf32>
    %cst_18 = arith.constant 1.000000e+00 : f32
    %50 = vector.broadcast %cst_18 : f32 to vector<2x32xf32>
    %51 = arith.addf %50, %49 : vector<2x32xf32>
    %52 = arith.divf %50, %51 : vector<2x32xf32>
    %53 = vector.extract_strided_slice %46 {offsets = [0, 32], sizes = [2, 32], strides = [1, 1]} : vector<2x128xf32> to vector<2x32xf32>
    %54 = arith.negf %53 : vector<2x32xf32>
    %55 = math.exp %54 : vector<2x32xf32>
    %cst_19 = arith.constant 1.000000e+00 : f32
    %56 = vector.broadcast %cst_19 : f32 to vector<2x32xf32>
    %57 = arith.addf %56, %55 : vector<2x32xf32>
    %58 = arith.divf %56, %57 : vector<2x32xf32>
    %59 = vector.extract_strided_slice %46 {offsets = [0, 64], sizes = [2, 32], strides = [1, 1]} : vector<2x128xf32> to vector<2x32xf32>
    %60 = math.tanh %59 : vector<2x32xf32>
    %61 = vector.extract_strided_slice %46 {offsets = [0, 96], sizes = [2, 32], strides = [1, 1]} : vector<2x128xf32> to vector<2x32xf32>
    %62 = arith.negf %61 : vector<2x32xf32>
    %63 = math.exp %62 : vector<2x32xf32>
    %cst_20 = arith.constant 1.000000e+00 : f32
    %64 = vector.broadcast %cst_20 : f32 to vector<2x32xf32>
    %65 = arith.addf %64, %63 : vector<2x32xf32>
    %66 = arith.divf %64, %65 : vector<2x32xf32>
    %67 = arith.mulf %58, %34 : vector<2x32xf32>
    %68 = arith.mulf %52, %60 : vector<2x32xf32>
    %69 = arith.addf %67, %68 : vector<2x32xf32>
    %70 = math.tanh %69 : vector<2x32xf32>
    %71 = arith.mulf %66, %70 : vector<2x32xf32>
    %72 = arith.index_cast %41 : i32 to index
    %c0_21 = arith.constant 0 : index
    %c0_22 = arith.constant 0 : index
    %73 = vector.load %arg5[%72, %c0_21, %c0_22] : memref<8x2x32xf32, #tpu.memory_space<vmem>>, vector<1x2x32xf32>
    %74 = vector.shape_cast %73 : vector<1x2x32xf32> to vector<2x32xf32>
    %75 = vector.shape_cast %71 : vector<2x32xf32> to vector<1x2x32xf32>
    tpu.vector_store %arg5[%72, %c0_21, %c0_22], %75 {strides = array<i32>} : memref<8x2x32xf32, #tpu.memory_space<vmem>>, vector<1x2x32xf32>,
    %c2_i32 = arith.constant 2 : i32
    %c7_i32_23 = arith.constant 7 : i32
    %76 = arith.subi %c7_i32_23, %c2_i32 : i32
    %77 = arith.index_cast %76 : i32 to index
    %c0_24 = arith.constant 0 : index
    %c0_25 = arith.constant 0 : index
    %78 = vector.load %arg1[%77, %c0_24, %c0_25] : memref<8x2x128xf32, #tpu.memory_space<vmem>>, vector<1x2x128xf32>
    %79 = vector.shape_cast %78 : vector<1x2x128xf32> to vector<2x128xf32>
    %cst_26 = arith.constant dense<0.000000e+00> : vector<2x128xf32>
    %80 = tpu.matmul %71, %3, %cst_26 {dimension_numbers = #tpu.dot_dimension_numbers<[1], [0], [0], [1], [0, 0, 1, 1], [], []>} : vector<2x32xf32>, vector<32x128xf32>, vector<2x128xf32> -> vector<2x128xf32>
    %81 = arith.addf %79, %80 : vector<2x128xf32>
    %82 = vector.extract_strided_slice %81 {offsets = [0, 0], sizes = [2, 32], strides = [1, 1]} : vector<2x128xf32> to vector<2x32xf32>
    %83 = arith.negf %82 : vector<2x32xf32>
    %84 = math.exp %83 : vector<2x32xf32>
    %cst_27 = arith.constant 1.000000e+00 : f32
    %85 = vector.broadcast %cst_27 : f32 to vector<2x32xf32>
    %86 = arith.addf %85, %84 : vector<2x32xf32>
    %87 = arith.divf %85, %86 : vector<2x32xf32>
    %88 = vector.extract_strided_slice %81 {offsets = [0, 32], sizes = [2, 32], strides = [1, 1]} : vector<2x128xf32> to vector<2x32xf32>
    %89 = arith.negf %88 : vector<2x32xf32>
    %90 = math.exp %89 : vector<2x32xf32>
    %cst_28 = arith.constant 1.000000e+00 : f32
    %91 = vector.broadcast %cst_28 : f32 to vector<2x32xf32>
    %92 = arith.addf %91, %90 : vector<2x32xf32>
    %93 = arith.divf %91, %92 : vector<2x32xf32>
    %94 = vector.extract_strided_slice %81 {offsets = [0, 64], sizes = [2, 32], strides = [1, 1]} : vector<2x128xf32> to vector<2x32xf32>
    %95 = math.tanh %94 : vector<2x32xf32>
    %96 = vector.extract_strided_slice %81 {offsets = [0, 96], sizes = [2, 32], strides = [1, 1]} : vector<2x128xf32> to vector<2x32xf32>
    %97 = arith.negf %96 : vector<2x32xf32>
    %98 = math.exp %97 : vector<2x32xf32>
    %cst_29 = arith.constant 1.000000e+00 : f32
    %99 = vector.broadcast %cst_29 : f32 to vector<2x32xf32>
    %100 = arith.addf %99, %98 : vector<2x32xf32>
    %101 = arith.divf %99, %100 : vector<2x32xf32>
    %102 = arith.mulf %93, %69 : vector<2x32xf32>
    %103 = arith.mulf %87, %95 : vector<2x32xf32>
    %104 = arith.addf %102, %103 : vector<2x32xf32>
    %105 = math.tanh %104 : vector<2x32xf32>
    %106 = arith.mulf %101, %105 : vector<2x32xf32>
    %107 = arith.index_cast %76 : i32 to index
    %c0_30 = arith.constant 0 : index
    %c0_31 = arith.constant 0 : index
    %108 = vector.load %arg5[%107, %c0_30, %c0_31] : memref<8x2x32xf32, #tpu.memory_space<vmem>>, vector<1x2x32xf32>
    %109 = vector.shape_cast %108 : vector<1x2x32xf32> to vector<2x32xf32>
    %110 = vector.shape_cast %106 : vector<2x32xf32> to vector<1x2x32xf32>
    tpu.vector_store %arg5[%107, %c0_30, %c0_31], %110 {strides = array<i32>} : memref<8x2x32xf32, #tpu.memory_space<vmem>>, vector<1x2x32xf32>,
    %c3_i32 = arith.constant 3 : i32
    %c7_i32_32 = arith.constant 7 : i32
    %111 = arith.subi %c7_i32_32, %c3_i32 : i32
    %112 = arith.index_cast %111 : i32 to index
    %c0_33 = arith.constant 0 : index
    %c0_34 = arith.constant 0 : index
    %113 = vector.load %arg1[%112, %c0_33, %c0_34] : memref<8x2x128xf32, #tpu.memory_space<vmem>>, vector<1x2x128xf32>
    %114 = vector.shape_cast %113 : vector<1x2x128xf32> to vector<2x128xf32>
    %cst_35 = arith.constant dense<0.000000e+00> : vector<2x128xf32>
    %115 = tpu.matmul %106, %3, %cst_35 {dimension_numbers = #tpu.dot_dimension_numbers<[1], [0], [0], [1], [0, 0, 1, 1], [], []>} : vector<2x32xf32>, vector<32x128xf32>, vector<2x128xf32> -> vector<2x128xf32>
    %116 = arith.addf %114, %115 : vector<2x128xf32>
    %117 = vector.extract_strided_slice %116 {offsets = [0, 0], sizes = [2, 32], strides = [1, 1]} : vector<2x128xf32> to vector<2x32xf32>
    %118 = arith.negf %117 : vector<2x32xf32>
    %119 = math.exp %118 : vector<2x32xf32>
    %cst_36 = arith.constant 1.000000e+00 : f32
    %120 = vector.broadcast %cst_36 : f32 to vector<2x32xf32>
    %121 = arith.addf %120, %119 : vector<2x32xf32>
    %122 = arith.divf %120, %121 : vector<2x32xf32>
    %123 = vector.extract_strided_slice %116 {offsets = [0, 32], sizes = [2, 32], strides = [1, 1]} : vector<2x128xf32> to vector<2x32xf32>
    %124 = arith.negf %123 : vector<2x32xf32>
    %125 = math.exp %124 : vector<2x32xf32>
    %cst_37 = arith.constant 1.000000e+00 : f32
    %126 = vector.broadcast %cst_37 : f32 to vector<2x32xf32>
    %127 = arith.addf %126, %125 : vector<2x32xf32>
    %128 = arith.divf %126, %127 : vector<2x32xf32>
    %129 = vector.extract_strided_slice %116 {offsets = [0, 64], sizes = [2, 32], strides = [1, 1]} : vector<2x128xf32> to vector<2x32xf32>
    %130 = math.tanh %129 : vector<2x32xf32>
    %131 = vector.extract_strided_slice %116 {offsets = [0, 96], sizes = [2, 32], strides = [1, 1]} : vector<2x128xf32> to vector<2x32xf32>
    %132 = arith.negf %131 : vector<2x32xf32>
    %133 = math.exp %132 : vector<2x32xf32>
    %cst_38 = arith.constant 1.000000e+00 : f32
    %134 = vector.broadcast %cst_38 : f32 to vector<2x32xf32>
    %135 = arith.addf %134, %133 : vector<2x32xf32>
    %136 = arith.divf %134, %135 : vector<2x32xf32>
    %137 = arith.mulf %128, %104 : vector<2x32xf32>
    %138 = arith.mulf %122, %130 : vector<2x32xf32>
    %139 = arith.addf %137, %138 : vector<2x32xf32>
    %140 = math.tanh %139 : vector<2x32xf32>
    %141 = arith.mulf %136, %140 : vector<2x32xf32>
    %142 = arith.index_cast %111 : i32 to index
    %c0_39 = arith.constant 0 : index
    %c0_40 = arith.constant 0 : index
    %143 = vector.load %arg5[%142, %c0_39, %c0_40] : memref<8x2x32xf32, #tpu.memory_space<vmem>>, vector<1x2x32xf32>
    %144 = vector.shape_cast %143 : vector<1x2x32xf32> to vector<2x32xf32>
    %145 = vector.shape_cast %141 : vector<2x32xf32> to vector<1x2x32xf32>
    tpu.vector_store %arg5[%142, %c0_39, %c0_40], %145 {strides = array<i32>} : memref<8x2x32xf32, #tpu.memory_space<vmem>>, vector<1x2x32xf32>,
    %c4_i32 = arith.constant 4 : i32
    %c7_i32_41 = arith.constant 7 : i32
    %146 = arith.subi %c7_i32_41, %c4_i32 : i32
    %147 = arith.index_cast %146 : i32 to index
    %c0_42 = arith.constant 0 : index
    %c0_43 = arith.constant 0 : index
    %148 = vector.load %arg1[%147, %c0_42, %c0_43] : memref<8x2x128xf32, #tpu.memory_space<vmem>>, vector<1x2x128xf32>
    %149 = vector.shape_cast %148 : vector<1x2x128xf32> to vector<2x128xf32>
    %cst_44 = arith.constant dense<0.000000e+00> : vector<2x128xf32>
    %150 = tpu.matmul %141, %3, %cst_44 {dimension_numbers = #tpu.dot_dimension_numbers<[1], [0], [0], [1], [0, 0, 1, 1], [], []>} : vector<2x32xf32>, vector<32x128xf32>, vector<2x128xf32> -> vector<2x128xf32>
    %151 = arith.addf %149, %150 : vector<2x128xf32>
    %152 = vector.extract_strided_slice %151 {offsets = [0, 0], sizes = [2, 32], strides = [1, 1]} : vector<2x128xf32> to vector<2x32xf32>
    %153 = arith.negf %152 : vector<2x32xf32>
    %154 = math.exp %153 : vector<2x32xf32>
    %cst_45 = arith.constant 1.000000e+00 : f32
    %155 = vector.broadcast %cst_45 : f32 to vector<2x32xf32>
    %156 = arith.addf %155, %154 : vector<2x32xf32>
    %157 = arith.divf %155, %156 : vector<2x32xf32>
    %158 = vector.extract_strided_slice %151 {offsets = [0, 32], sizes = [2, 32], strides = [1, 1]} : vector<2x128xf32> to vector<2x32xf32>
    %159 = arith.negf %158 : vector<2x32xf32>
    %160 = math.exp %159 : vector<2x32xf32>
    %cst_46 = arith.constant 1.000000e+00 : f32
    %161 = vector.broadcast %cst_46 : f32 to vector<2x32xf32>
    %162 = arith.addf %161, %160 : vector<2x32xf32>
    %163 = arith.divf %161, %162 : vector<2x32xf32>
    %164 = vector.extract_strided_slice %151 {offsets = [0, 64], sizes = [2, 32], strides = [1, 1]} : vector<2x128xf32> to vector<2x32xf32>
    %165 = math.tanh %164 : vector<2x32xf32>
    %166 = vector.extract_strided_slice %151 {offsets = [0, 96], sizes = [2, 32], strides = [1, 1]} : vector<2x128xf32> to vector<2x32xf32>
    %167 = arith.negf %166 : vector<2x32xf32>
    %168 = math.exp %167 : vector<2x32xf32>
    %cst_47 = arith.constant 1.000000e+00 : f32
    %169 = vector.broadcast %cst_47 : f32 to vector<2x32xf32>
    %170 = arith.addf %169, %168 : vector<2x32xf32>
    %171 = arith.divf %169, %170 : vector<2x32xf32>
    %172 = arith.mulf %163, %139 : vector<2x32xf32>
    %173 = arith.mulf %157, %165 : vector<2x32xf32>
    %174 = arith.addf %172, %173 : vector<2x32xf32>
    %175 = math.tanh %174 : vector<2x32xf32>
    %176 = arith.mulf %171, %175 : vector<2x32xf32>
    %177 = arith.index_cast %146 : i32 to index
    %c0_48 = arith.constant 0 : index
    %c0_49 = arith.constant 0 : index
    %178 = vector.load %arg5[%177, %c0_48, %c0_49] : memref<8x2x32xf32, #tpu.memory_space<vmem>>, vector<1x2x32xf32>
    %179 = vector.shape_cast %178 : vector<1x2x32xf32> to vector<2x32xf32>
    %180 = vector.shape_cast %176 : vector<2x32xf32> to vector<1x2x32xf32>
    tpu.vector_store %arg5[%177, %c0_48, %c0_49], %180 {strides = array<i32>} : memref<8x2x32xf32, #tpu.memory_space<vmem>>, vector<1x2x32xf32>,
    %c5_i32 = arith.constant 5 : i32
    %c7_i32_50 = arith.constant 7 : i32
    %181 = arith.subi %c7_i32_50, %c5_i32 : i32
    %182 = arith.index_cast %181 : i32 to index
    %c0_51 = arith.constant 0 : index
    %c0_52 = arith.constant 0 : index
    %183 = vector.load %arg1[%182, %c0_51, %c0_52] : memref<8x2x128xf32, #tpu.memory_space<vmem>>, vector<1x2x128xf32>
    %184 = vector.shape_cast %183 : vector<1x2x128xf32> to vector<2x128xf32>
    %cst_53 = arith.constant dense<0.000000e+00> : vector<2x128xf32>
    %185 = tpu.matmul %176, %3, %cst_53 {dimension_numbers = #tpu.dot_dimension_numbers<[1], [0], [0], [1], [0, 0, 1, 1], [], []>} : vector<2x32xf32>, vector<32x128xf32>, vector<2x128xf32> -> vector<2x128xf32>
    %186 = arith.addf %184, %185 : vector<2x128xf32>
    %187 = vector.extract_strided_slice %186 {offsets = [0, 0], sizes = [2, 32], strides = [1, 1]} : vector<2x128xf32> to vector<2x32xf32>
    %188 = arith.negf %187 : vector<2x32xf32>
    %189 = math.exp %188 : vector<2x32xf32>
    %cst_54 = arith.constant 1.000000e+00 : f32
    %190 = vector.broadcast %cst_54 : f32 to vector<2x32xf32>
    %191 = arith.addf %190, %189 : vector<2x32xf32>
    %192 = arith.divf %190, %191 : vector<2x32xf32>
    %193 = vector.extract_strided_slice %186 {offsets = [0, 32], sizes = [2, 32], strides = [1, 1]} : vector<2x128xf32> to vector<2x32xf32>
    %194 = arith.negf %193 : vector<2x32xf32>
    %195 = math.exp %194 : vector<2x32xf32>
    %cst_55 = arith.constant 1.000000e+00 : f32
    %196 = vector.broadcast %cst_55 : f32 to vector<2x32xf32>
    %197 = arith.addf %196, %195 : vector<2x32xf32>
    %198 = arith.divf %196, %197 : vector<2x32xf32>
    %199 = vector.extract_strided_slice %186 {offsets = [0, 64], sizes = [2, 32], strides = [1, 1]} : vector<2x128xf32> to vector<2x32xf32>
    %200 = math.tanh %199 : vector<2x32xf32>
    %201 = vector.extract_strided_slice %186 {offsets = [0, 96], sizes = [2, 32], strides = [1, 1]} : vector<2x128xf32> to vector<2x32xf32>
    %202 = arith.negf %201 : vector<2x32xf32>
    %203 = math.exp %202 : vector<2x32xf32>
    %cst_56 = arith.constant 1.000000e+00 : f32
    %204 = vector.broadcast %cst_56 : f32 to vector<2x32xf32>
    %205 = arith.addf %204, %203 : vector<2x32xf32>
    %206 = arith.divf %204, %205 : vector<2x32xf32>
    %207 = arith.mulf %198, %174 : vector<2x32xf32>
    %208 = arith.mulf %192, %200 : vector<2x32xf32>
    %209 = arith.addf %207, %208 : vector<2x32xf32>
    %210 = math.tanh %209 : vector<2x32xf32>
    %211 = arith.mulf %206, %210 : vector<2x32xf32>
    %212 = arith.index_cast %181 : i32 to index
    %c0_57 = arith.constant 0 : index
    %c0_58 = arith.constant 0 : index
    %213 = vector.load %arg5[%212, %c0_57, %c0_58] : memref<8x2x32xf32, #tpu.memory_space<vmem>>, vector<1x2x32xf32>
    %214 = vector.shape_cast %213 : vector<1x2x32xf32> to vector<2x32xf32>
    %215 = vector.shape_cast %211 : vector<2x32xf32> to vector<1x2x32xf32>
    tpu.vector_store %arg5[%212, %c0_57, %c0_58], %215 {strides = array<i32>} : memref<8x2x32xf32, #tpu.memory_space<vmem>>, vector<1x2x32xf32>,
    %c6_i32 = arith.constant 6 : i32
    %c7_i32_59 = arith.constant 7 : i32
    %216 = arith.subi %c7_i32_59, %c6_i32 : i32
    %217 = arith.index_cast %216 : i32 to index
    %c0_60 = arith.constant 0 : index
    %c0_61 = arith.constant 0 : index
    %218 = vector.load %arg1[%217, %c0_60, %c0_61] : memref<8x2x128xf32, #tpu.memory_space<vmem>>, vector<1x2x128xf32>
    %219 = vector.shape_cast %218 : vector<1x2x128xf32> to vector<2x128xf32>
    %cst_62 = arith.constant dense<0.000000e+00> : vector<2x128xf32>
    %220 = tpu.matmul %211, %3, %cst_62 {dimension_numbers = #tpu.dot_dimension_numbers<[1], [0], [0], [1], [0, 0, 1, 1], [], []>} : vector<2x32xf32>, vector<32x128xf32>, vector<2x128xf32> -> vector<2x128xf32>
    %221 = arith.addf %219, %220 : vector<2x128xf32>
    %222 = vector.extract_strided_slice %221 {offsets = [0, 0], sizes = [2, 32], strides = [1, 1]} : vector<2x128xf32> to vector<2x32xf32>
    %223 = arith.negf %222 : vector<2x32xf32>
    %224 = math.exp %223 : vector<2x32xf32>
    %cst_63 = arith.constant 1.000000e+00 : f32
    %225 = vector.broadcast %cst_63 : f32 to vector<2x32xf32>
    %226 = arith.addf %225, %224 : vector<2x32xf32>
    %227 = arith.divf %225, %226 : vector<2x32xf32>
    %228 = vector.extract_strided_slice %221 {offsets = [0, 32], sizes = [2, 32], strides = [1, 1]} : vector<2x128xf32> to vector<2x32xf32>
    %229 = arith.negf %228 : vector<2x32xf32>
    %230 = math.exp %229 : vector<2x32xf32>
    %cst_64 = arith.constant 1.000000e+00 : f32
    %231 = vector.broadcast %cst_64 : f32 to vector<2x32xf32>
    %232 = arith.addf %231, %230 : vector<2x32xf32>
    %233 = arith.divf %231, %232 : vector<2x32xf32>
    %234 = vector.extract_strided_slice %221 {offsets = [0, 64], sizes = [2, 32], strides = [1, 1]} : vector<2x128xf32> to vector<2x32xf32>
    %235 = math.tanh %234 : vector<2x32xf32>
    %236 = vector.extract_strided_slice %221 {offsets = [0, 96], sizes = [2, 32], strides = [1, 1]} : vector<2x128xf32> to vector<2x32xf32>
    %237 = arith.negf %236 : vector<2x32xf32>
    %238 = math.exp %237 : vector<2x32xf32>
    %cst_65 = arith.constant 1.000000e+00 : f32
    %239 = vector.broadcast %cst_65 : f32 to vector<2x32xf32>
    %240 = arith.addf %239, %238 : vector<2x32xf32>
    %241 = arith.divf %239, %240 : vector<2x32xf32>
    %242 = arith.mulf %233, %209 : vector<2x32xf32>
    %243 = arith.mulf %227, %235 : vector<2x32xf32>
    %244 = arith.addf %242, %243 : vector<2x32xf32>
    %245 = math.tanh %244 : vector<2x32xf32>
    %246 = arith.mulf %241, %245 : vector<2x32xf32>
    %247 = arith.index_cast %216 : i32 to index
    %c0_66 = arith.constant 0 : index
    %c0_67 = arith.constant 0 : index
    %248 = vector.load %arg5[%247, %c0_66, %c0_67] : memref<8x2x32xf32, #tpu.memory_space<vmem>>, vector<1x2x32xf32>
    %249 = vector.shape_cast %248 : vector<1x2x32xf32> to vector<2x32xf32>
    %250 = vector.shape_cast %246 : vector<2x32xf32> to vector<1x2x32xf32>
    tpu.vector_store %arg5[%247, %c0_66, %c0_67], %250 {strides = array<i32>} : memref<8x2x32xf32, #tpu.memory_space<vmem>>, vector<1x2x32xf32>,
    %c7_i32_68 = arith.constant 7 : i32
    %c7_i32_69 = arith.constant 7 : i32
    %251 = arith.subi %c7_i32_69, %c7_i32_68 : i32
    %252 = arith.index_cast %251 : i32 to index
    %c0_70 = arith.constant 0 : index
    %c0_71 = arith.constant 0 : index
    %253 = vector.load %arg1[%252, %c0_70, %c0_71] : memref<8x2x128xf32, #tpu.memory_space<vmem>>, vector<1x2x128xf32>
    %254 = vector.shape_cast %253 : vector<1x2x128xf32> to vector<2x128xf32>
    %cst_72 = arith.constant dense<0.000000e+00> : vector<2x128xf32>
    %255 = tpu.matmul %246, %3, %cst_72 {dimension_numbers = #tpu.dot_dimension_numbers<[1], [0], [0], [1], [0, 0, 1, 1], [], []>} : vector<2x32xf32>, vector<32x128xf32>, vector<2x128xf32> -> vector<2x128xf32>
    %256 = arith.addf %254, %255 : vector<2x128xf32>
    %257 = vector.extract_strided_slice %256 {offsets = [0, 0], sizes = [2, 32], strides = [1, 1]} : vector<2x128xf32> to vector<2x32xf32>
    %258 = arith.negf %257 : vector<2x32xf32>
    %259 = math.exp %258 : vector<2x32xf32>
    %cst_73 = arith.constant 1.000000e+00 : f32
    %260 = vector.broadcast %cst_73 : f32 to vector<2x32xf32>
    %261 = arith.addf %260, %259 : vector<2x32xf32>
    %262 = arith.divf %260, %261 : vector<2x32xf32>
    %263 = vector.extract_strided_slice %256 {offsets = [0, 32], sizes = [2, 32], strides = [1, 1]} : vector<2x128xf32> to vector<2x32xf32>
    %264 = arith.negf %263 : vector<2x32xf32>
    %265 = math.exp %264 : vector<2x32xf32>
    %cst_74 = arith.constant 1.000000e+00 : f32
    %266 = vector.broadcast %cst_74 : f32 to vector<2x32xf32>
    %267 = arith.addf %266, %265 : vector<2x32xf32>
    %268 = arith.divf %266, %267 : vector<2x32xf32>
    %269 = vector.extract_strided_slice %256 {offsets = [0, 64], sizes = [2, 32], strides = [1, 1]} : vector<2x128xf32> to vector<2x32xf32>
    %270 = math.tanh %269 : vector<2x32xf32>
    %271 = vector.extract_strided_slice %256 {offsets = [0, 96], sizes = [2, 32], strides = [1, 1]} : vector<2x128xf32> to vector<2x32xf32>
    %272 = arith.negf %271 : vector<2x32xf32>
    %273 = math.exp %272 : vector<2x32xf32>
    %cst_75 = arith.constant 1.000000e+00 : f32
    %274 = vector.broadcast %cst_75 : f32 to vector<2x32xf32>
    %275 = arith.addf %274, %273 : vector<2x32xf32>
    %276 = arith.divf %274, %275 : vector<2x32xf32>
    %277 = arith.mulf %268, %244 : vector<2x32xf32>
    %278 = arith.mulf %262, %270 : vector<2x32xf32>
    %279 = arith.addf %277, %278 : vector<2x32xf32>
    %280 = math.tanh %279 : vector<2x32xf32>
    %281 = arith.mulf %276, %280 : vector<2x32xf32>
    %282 = arith.index_cast %251 : i32 to index
    %c0_76 = arith.constant 0 : index
    %c0_77 = arith.constant 0 : index
    %283 = vector.load %arg5[%282, %c0_76, %c0_77] : memref<8x2x32xf32, #tpu.memory_space<vmem>>, vector<1x2x32xf32>
    %284 = vector.shape_cast %283 : vector<1x2x32xf32> to vector<2x32xf32>
    %285 = vector.shape_cast %281 : vector<2x32xf32> to vector<1x2x32xf32>
    tpu.vector_store %arg5[%282, %c0_76, %c0_77], %285 {strides = array<i32>} : memref<8x2x32xf32, #tpu.memory_space<vmem>>, vector<1x2x32xf32>,
    %c8_i32 = arith.constant 8 : i32
    %c0_78 = arith.constant 0 : index
    %c0_79 = arith.constant 0 : index
    %286 = vector.load %arg8[%c0_78, %c0_79] : memref<2x32xf32, #tpu.memory_space<vmem>>, vector<2x32xf32>
    tpu.vector_store %arg8[%c0_78, %c0_79], %281 {strides = array<i32>} : memref<2x32xf32, #tpu.memory_space<vmem>>, vector<2x32xf32>,
    %c0_80 = arith.constant 0 : index
    %c0_81 = arith.constant 0 : index
    %287 = vector.load %arg9[%c0_80, %c0_81] : memref<2x32xf32, #tpu.memory_space<vmem>>, vector<2x32xf32>
    tpu.vector_store %arg9[%c0_80, %c0_81], %279 {strides = array<i32>} : memref<2x32xf32, #tpu.memory_space<vmem>>, vector<2x32xf32>,
    %c0_i32_82 = arith.constant 0 : i32
    %288 = arith.cmpi eq, %arg0, %c0_i32_82 : i32
    %289 = arith.extui %288 : i1 to i32
    %c0_i32_83 = arith.constant 0 : i32
    %290 = arith.cmpi ne, %289, %c0_i32_83 : i32
    scf.if %290 {
      %c0_84 = arith.constant 0 : index
      %c0_85 = arith.constant 0 : index
      %291 = vector.load %arg6[%c0_84, %c0_85] : memref<2x32xf32, #tpu.memory_space<vmem>>, vector<2x32xf32>
      tpu.vector_store %arg6[%c0_84, %c0_85], %281 {strides = array<i32>} : memref<2x32xf32, #tpu.memory_space<vmem>>, vector<2x32xf32>,
      %c0_86 = arith.constant 0 : index
      %c0_87 = arith.constant 0 : index
      %292 = vector.load %arg7[%c0_86, %c0_87] : memref<2x32xf32, #tpu.memory_space<vmem>>, vector<2x32xf32>
      tpu.vector_store %arg7[%c0_86, %c0_87], %279 {strides = array<i32>} : memref<2x32xf32, #tpu.memory_space<vmem>>, vector<2x32xf32>,
    } else {
    }
    return
  }
  func.func @transform_0(%arg0: i32) -> (i32, i32, i32) {
    %c0_i32 = arith.constant 0 : i32
    %0 = arith.subi %c0_i32, %arg0 : i32
    %c0_i32_0 = arith.constant 0 : i32
    %c1_i32 = arith.constant 1 : i32
    %c0_i32_1 = arith.constant 0 : i32
    return %0, %c0_i32_0, %c1_i32 : i32, i32, i32
  }
  func.func @transform_1(%arg0: i32) -> (i32, i32) {
    %c0_i32 = arith.constant 0 : i32
    %c0_i32_0 = arith.constant 0 : i32
    %c0_i32_1 = arith.constant 0 : i32
    return %c0_i32, %c0_i32_0 : i32, i32
  }
  func.func @transform_2(%arg0: i32) -> (i32, i32) {
    %c0_i32 = arith.constant 0 : i32
    %c0_i32_0 = arith.constant 0 : i32
    %c0_i32_1 = arith.constant 0 : i32
    return %c0_i32, %c0_i32_0 : i32, i32
  }
  func.func @transform_3(%arg0: i32) -> (i32, i32) {
    %c0_i32 = arith.constant 0 : i32
    %c0_i32_0 = arith.constant 0 : i32
    %c0_i32_1 = arith.constant 0 : i32
    return %c0_i32, %c0_i32_0 : i32, i32
  }
  func.func @transform_4(%arg0: i32) -> (i32, i32, i32) {
    %c0_i32 = arith.constant 0 : i32
    %0 = arith.subi %c0_i32, %arg0 : i32
    %c0_i32_0 = arith.constant 0 : i32
    %c0_i32_1 = arith.constant 0 : i32
    %c0_i32_2 = arith.constant 0 : i32
    return %0, %c0_i32_0, %c0_i32_1 : i32, i32, i32
  }
  func.func @transform_5(%arg0: i32) -> (i32, i32) {
    %c0_i32 = arith.constant 0 : i32
    %c0_i32_0 = arith.constant 0 : i32
    %c0_i32_1 = arith.constant 0 : i32
    return %c0_i32, %c0_i32_0 : i32, i32
  }
  func.func @transform_6(%arg0: i32) -> (i32, i32) {
    %c0_i32 = arith.constant 0 : i32
    %c0_i32_0 = arith.constant 0 : i32
    %c0_i32_1 = arith.constant 0 : i32
    return %c0_i32, %c0_i32_0 : i32, i32
  }
}

module attributes {stable_mosaic.version = 11 : i64} {
  func.func @_lstm_rec_kernel(%arg0: i32, %arg1: memref<8x2x128xf32, #tpu.memory_space<vmem>>, %arg2: memref<32x128xf32, #tpu.memory_space<vmem>>, %arg3: memref<2x32xf32, #tpu.memory_space<vmem>>, %arg4: memref<2x32xf32, #tpu.memory_space<vmem>>, %arg5: memref<8x2x32xf32, #tpu.memory_space<vmem>>, %arg6: memref<2x32xf32, #tpu.memory_space<vmem>>, %arg7: memref<2x32xf32, #tpu.memory_space<vmem>>, %arg8: memref<2x32xf32, #tpu.memory_space<vmem>>, %arg9: memref<2x32xf32, #tpu.memory_space<vmem>>) attributes {dimension_semantics = [#tpu.dimension_semantics<arbitrary>], iteration_bounds = array<i64: 1>, scalar_prefetch = 0 : i64, scratch_operands = 2 : i64, tpu.core_type = #tpu.core_type<tc>, window_params = [{transform_indices = @transform_0, window_bounds = array<i64: 8, 2, 128>}, {pipeline_mode = #tpu.pipeline_mode<synchronous>, transform_indices = @transform_1, window_bounds = array<i64: 32, 128>}, {pipeline_mode = #tpu.pipeline_mode<synchronous>, transform_indices = @transform_2, window_bounds = array<i64: 2, 32>}, {pipeline_mode = #tpu.pipeline_mode<synchronous>, transform_indices = @transform_3, window_bounds = array<i64: 2, 32>}, {transform_indices = @transform_4, window_bounds = array<i64: 8, 2, 32>}, {pipeline_mode = #tpu.pipeline_mode<synchronous>, transform_indices = @transform_5, window_bounds = array<i64: 2, 32>}, {pipeline_mode = #tpu.pipeline_mode<synchronous>, transform_indices = @transform_6, window_bounds = array<i64: 2, 32>}]} {
    %c0_i32 = arith.constant 0 : i32
    %0 = arith.cmpi eq, %arg0, %c0_i32 : i32
    %1 = arith.extui %0 : i1 to i32
    %c0_i32_0 = arith.constant 0 : i32
    %2 = arith.cmpi ne, %1, %c0_i32_0 : i32
    scf.if %2 {
      %c0_76 = arith.constant 0 : index
      %c0_77 = arith.constant 0 : index
      %283 = vector.load %arg3[%c0_76, %c0_77] : memref<2x32xf32, #tpu.memory_space<vmem>>, vector<2x32xf32>
      %c0_78 = arith.constant 0 : index
      %c0_79 = arith.constant 0 : index
      %284 = vector.load %arg8[%c0_78, %c0_79] : memref<2x32xf32, #tpu.memory_space<vmem>>, vector<2x32xf32>
      tpu.vector_store %arg8[%c0_78, %c0_79], %283 {strides = array<i32>} : memref<2x32xf32, #tpu.memory_space<vmem>>, vector<2x32xf32>,
      %c0_80 = arith.constant 0 : index
      %c0_81 = arith.constant 0 : index
      %285 = vector.load %arg4[%c0_80, %c0_81] : memref<2x32xf32, #tpu.memory_space<vmem>>, vector<2x32xf32>
      %c0_82 = arith.constant 0 : index
      %c0_83 = arith.constant 0 : index
      %286 = vector.load %arg9[%c0_82, %c0_83] : memref<2x32xf32, #tpu.memory_space<vmem>>, vector<2x32xf32>
      tpu.vector_store %arg9[%c0_82, %c0_83], %285 {strides = array<i32>} : memref<2x32xf32, #tpu.memory_space<vmem>>, vector<2x32xf32>,
    } else {
    }
    %c0 = arith.constant 0 : index
    %c0_1 = arith.constant 0 : index
    %3 = vector.load %arg2[%c0, %c0_1] : memref<32x128xf32, #tpu.memory_space<vmem>>, vector<32x128xf32>
    %c0_2 = arith.constant 0 : index
    %c0_3 = arith.constant 0 : index
    %4 = vector.load %arg8[%c0_2, %c0_3] : memref<2x32xf32, #tpu.memory_space<vmem>>, vector<2x32xf32>
    %c0_4 = arith.constant 0 : index
    %c0_5 = arith.constant 0 : index
    %5 = vector.load %arg9[%c0_4, %c0_5] : memref<2x32xf32, #tpu.memory_space<vmem>>, vector<2x32xf32>
    %c0_i32_6 = arith.constant 0 : i32
    %6 = arith.index_cast %c0_i32_6 : i32 to index
    %c0_7 = arith.constant 0 : index
    %c0_8 = arith.constant 0 : index
    %7 = vector.load %arg1[%6, %c0_7, %c0_8] : memref<8x2x128xf32, #tpu.memory_space<vmem>>, vector<1x2x128xf32>
    %8 = vector.shape_cast %7 : vector<1x2x128xf32> to vector<2x128xf32>
    %cst = arith.constant dense<0.000000e+00> : vector<2x128xf32>
    %9 = tpu.matmul %4, %3, %cst {dimension_numbers = #tpu.dot_dimension_numbers<[1], [0], [0], [1], [0, 0, 1, 1], [], []>} : vector<2x32xf32>, vector<32x128xf32>, vector<2x128xf32> -> vector<2x128xf32>
    %10 = arith.addf %8, %9 : vector<2x128xf32>
    %11 = vector.extract_strided_slice %10 {offsets = [0, 0], sizes = [2, 32], strides = [1, 1]} : vector<2x128xf32> to vector<2x32xf32>
    %12 = arith.negf %11 : vector<2x32xf32>
    %13 = math.exp %12 : vector<2x32xf32>
    %cst_9 = arith.constant 1.000000e+00 : f32
    %14 = vector.broadcast %cst_9 : f32 to vector<2x32xf32>
    %15 = arith.addf %14, %13 : vector<2x32xf32>
    %16 = arith.divf %14, %15 : vector<2x32xf32>
    %17 = vector.extract_strided_slice %10 {offsets = [0, 32], sizes = [2, 32], strides = [1, 1]} : vector<2x128xf32> to vector<2x32xf32>
    %18 = arith.negf %17 : vector<2x32xf32>
    %19 = math.exp %18 : vector<2x32xf32>
    %cst_10 = arith.constant 1.000000e+00 : f32
    %20 = vector.broadcast %cst_10 : f32 to vector<2x32xf32>
    %21 = arith.addf %20, %19 : vector<2x32xf32>
    %22 = arith.divf %20, %21 : vector<2x32xf32>
    %23 = vector.extract_strided_slice %10 {offsets = [0, 64], sizes = [2, 32], strides = [1, 1]} : vector<2x128xf32> to vector<2x32xf32>
    %24 = math.tanh %23 : vector<2x32xf32>
    %25 = vector.extract_strided_slice %10 {offsets = [0, 96], sizes = [2, 32], strides = [1, 1]} : vector<2x128xf32> to vector<2x32xf32>
    %26 = arith.negf %25 : vector<2x32xf32>
    %27 = math.exp %26 : vector<2x32xf32>
    %cst_11 = arith.constant 1.000000e+00 : f32
    %28 = vector.broadcast %cst_11 : f32 to vector<2x32xf32>
    %29 = arith.addf %28, %27 : vector<2x32xf32>
    %30 = arith.divf %28, %29 : vector<2x32xf32>
    %31 = arith.mulf %22, %5 : vector<2x32xf32>
    %32 = arith.mulf %16, %24 : vector<2x32xf32>
    %33 = arith.addf %31, %32 : vector<2x32xf32>
    %34 = math.tanh %33 : vector<2x32xf32>
    %35 = arith.mulf %30, %34 : vector<2x32xf32>
    %36 = arith.index_cast %c0_i32_6 : i32 to index
    %c0_12 = arith.constant 0 : index
    %c0_13 = arith.constant 0 : index
    %37 = vector.load %arg5[%36, %c0_12, %c0_13] : memref<8x2x32xf32, #tpu.memory_space<vmem>>, vector<1x2x32xf32>
    %38 = vector.shape_cast %37 : vector<1x2x32xf32> to vector<2x32xf32>
    %39 = vector.shape_cast %35 : vector<2x32xf32> to vector<1x2x32xf32>
    tpu.vector_store %arg5[%36, %c0_12, %c0_13], %39 {strides = array<i32>} : memref<8x2x32xf32, #tpu.memory_space<vmem>>, vector<1x2x32xf32>,
    %c1_i32 = arith.constant 1 : i32
    %40 = arith.index_cast %c1_i32 : i32 to index
    %c0_14 = arith.constant 0 : index
    %c0_15 = arith.constant 0 : index
    %41 = vector.load %arg1[%40, %c0_14, %c0_15] : memref<8x2x128xf32, #tpu.memory_space<vmem>>, vector<1x2x128xf32>
    %42 = vector.shape_cast %41 : vector<1x2x128xf32> to vector<2x128xf32>
    %cst_16 = arith.constant dense<0.000000e+00> : vector<2x128xf32>
    %43 = tpu.matmul %35, %3, %cst_16 {dimension_numbers = #tpu.dot_dimension_numbers<[1], [0], [0], [1], [0, 0, 1, 1], [], []>} : vector<2x32xf32>, vector<32x128xf32>, vector<2x128xf32> -> vector<2x128xf32>
    %44 = arith.addf %42, %43 : vector<2x128xf32>
    %45 = vector.extract_strided_slice %44 {offsets = [0, 0], sizes = [2, 32], strides = [1, 1]} : vector<2x128xf32> to vector<2x32xf32>
    %46 = arith.negf %45 : vector<2x32xf32>
    %47 = math.exp %46 : vector<2x32xf32>
    %cst_17 = arith.constant 1.000000e+00 : f32
    %48 = vector.broadcast %cst_17 : f32 to vector<2x32xf32>
    %49 = arith.addf %48, %47 : vector<2x32xf32>
    %50 = arith.divf %48, %49 : vector<2x32xf32>
    %51 = vector.extract_strided_slice %44 {offsets = [0, 32], sizes = [2, 32], strides = [1, 1]} : vector<2x128xf32> to vector<2x32xf32>
    %52 = arith.negf %51 : vector<2x32xf32>
    %53 = math.exp %52 : vector<2x32xf32>
    %cst_18 = arith.constant 1.000000e+00 : f32
    %54 = vector.broadcast %cst_18 : f32 to vector<2x32xf32>
    %55 = arith.addf %54, %53 : vector<2x32xf32>
    %56 = arith.divf %54, %55 : vector<2x32xf32>
    %57 = vector.extract_strided_slice %44 {offsets = [0, 64], sizes = [2, 32], strides = [1, 1]} : vector<2x128xf32> to vector<2x32xf32>
    %58 = math.tanh %57 : vector<2x32xf32>
    %59 = vector.extract_strided_slice %44 {offsets = [0, 96], sizes = [2, 32], strides = [1, 1]} : vector<2x128xf32> to vector<2x32xf32>
    %60 = arith.negf %59 : vector<2x32xf32>
    %61 = math.exp %60 : vector<2x32xf32>
    %cst_19 = arith.constant 1.000000e+00 : f32
    %62 = vector.broadcast %cst_19 : f32 to vector<2x32xf32>
    %63 = arith.addf %62, %61 : vector<2x32xf32>
    %64 = arith.divf %62, %63 : vector<2x32xf32>
    %65 = arith.mulf %56, %33 : vector<2x32xf32>
    %66 = arith.mulf %50, %58 : vector<2x32xf32>
    %67 = arith.addf %65, %66 : vector<2x32xf32>
    %68 = math.tanh %67 : vector<2x32xf32>
    %69 = arith.mulf %64, %68 : vector<2x32xf32>
    %70 = arith.index_cast %c1_i32 : i32 to index
    %c0_20 = arith.constant 0 : index
    %c0_21 = arith.constant 0 : index
    %71 = vector.load %arg5[%70, %c0_20, %c0_21] : memref<8x2x32xf32, #tpu.memory_space<vmem>>, vector<1x2x32xf32>
    %72 = vector.shape_cast %71 : vector<1x2x32xf32> to vector<2x32xf32>
    %73 = vector.shape_cast %69 : vector<2x32xf32> to vector<1x2x32xf32>
    tpu.vector_store %arg5[%70, %c0_20, %c0_21], %73 {strides = array<i32>} : memref<8x2x32xf32, #tpu.memory_space<vmem>>, vector<1x2x32xf32>,
    %c2_i32 = arith.constant 2 : i32
    %74 = arith.index_cast %c2_i32 : i32 to index
    %c0_22 = arith.constant 0 : index
    %c0_23 = arith.constant 0 : index
    %75 = vector.load %arg1[%74, %c0_22, %c0_23] : memref<8x2x128xf32, #tpu.memory_space<vmem>>, vector<1x2x128xf32>
    %76 = vector.shape_cast %75 : vector<1x2x128xf32> to vector<2x128xf32>
    %cst_24 = arith.constant dense<0.000000e+00> : vector<2x128xf32>
    %77 = tpu.matmul %69, %3, %cst_24 {dimension_numbers = #tpu.dot_dimension_numbers<[1], [0], [0], [1], [0, 0, 1, 1], [], []>} : vector<2x32xf32>, vector<32x128xf32>, vector<2x128xf32> -> vector<2x128xf32>
    %78 = arith.addf %76, %77 : vector<2x128xf32>
    %79 = vector.extract_strided_slice %78 {offsets = [0, 0], sizes = [2, 32], strides = [1, 1]} : vector<2x128xf32> to vector<2x32xf32>
    %80 = arith.negf %79 : vector<2x32xf32>
    %81 = math.exp %80 : vector<2x32xf32>
    %cst_25 = arith.constant 1.000000e+00 : f32
    %82 = vector.broadcast %cst_25 : f32 to vector<2x32xf32>
    %83 = arith.addf %82, %81 : vector<2x32xf32>
    %84 = arith.divf %82, %83 : vector<2x32xf32>
    %85 = vector.extract_strided_slice %78 {offsets = [0, 32], sizes = [2, 32], strides = [1, 1]} : vector<2x128xf32> to vector<2x32xf32>
    %86 = arith.negf %85 : vector<2x32xf32>
    %87 = math.exp %86 : vector<2x32xf32>
    %cst_26 = arith.constant 1.000000e+00 : f32
    %88 = vector.broadcast %cst_26 : f32 to vector<2x32xf32>
    %89 = arith.addf %88, %87 : vector<2x32xf32>
    %90 = arith.divf %88, %89 : vector<2x32xf32>
    %91 = vector.extract_strided_slice %78 {offsets = [0, 64], sizes = [2, 32], strides = [1, 1]} : vector<2x128xf32> to vector<2x32xf32>
    %92 = math.tanh %91 : vector<2x32xf32>
    %93 = vector.extract_strided_slice %78 {offsets = [0, 96], sizes = [2, 32], strides = [1, 1]} : vector<2x128xf32> to vector<2x32xf32>
    %94 = arith.negf %93 : vector<2x32xf32>
    %95 = math.exp %94 : vector<2x32xf32>
    %cst_27 = arith.constant 1.000000e+00 : f32
    %96 = vector.broadcast %cst_27 : f32 to vector<2x32xf32>
    %97 = arith.addf %96, %95 : vector<2x32xf32>
    %98 = arith.divf %96, %97 : vector<2x32xf32>
    %99 = arith.mulf %90, %67 : vector<2x32xf32>
    %100 = arith.mulf %84, %92 : vector<2x32xf32>
    %101 = arith.addf %99, %100 : vector<2x32xf32>
    %102 = math.tanh %101 : vector<2x32xf32>
    %103 = arith.mulf %98, %102 : vector<2x32xf32>
    %104 = arith.index_cast %c2_i32 : i32 to index
    %c0_28 = arith.constant 0 : index
    %c0_29 = arith.constant 0 : index
    %105 = vector.load %arg5[%104, %c0_28, %c0_29] : memref<8x2x32xf32, #tpu.memory_space<vmem>>, vector<1x2x32xf32>
    %106 = vector.shape_cast %105 : vector<1x2x32xf32> to vector<2x32xf32>
    %107 = vector.shape_cast %103 : vector<2x32xf32> to vector<1x2x32xf32>
    tpu.vector_store %arg5[%104, %c0_28, %c0_29], %107 {strides = array<i32>} : memref<8x2x32xf32, #tpu.memory_space<vmem>>, vector<1x2x32xf32>,
    %c3_i32 = arith.constant 3 : i32
    %108 = arith.index_cast %c3_i32 : i32 to index
    %c0_30 = arith.constant 0 : index
    %c0_31 = arith.constant 0 : index
    %109 = vector.load %arg1[%108, %c0_30, %c0_31] : memref<8x2x128xf32, #tpu.memory_space<vmem>>, vector<1x2x128xf32>
    %110 = vector.shape_cast %109 : vector<1x2x128xf32> to vector<2x128xf32>
    %cst_32 = arith.constant dense<0.000000e+00> : vector<2x128xf32>
    %111 = tpu.matmul %103, %3, %cst_32 {dimension_numbers = #tpu.dot_dimension_numbers<[1], [0], [0], [1], [0, 0, 1, 1], [], []>} : vector<2x32xf32>, vector<32x128xf32>, vector<2x128xf32> -> vector<2x128xf32>
    %112 = arith.addf %110, %111 : vector<2x128xf32>
    %113 = vector.extract_strided_slice %112 {offsets = [0, 0], sizes = [2, 32], strides = [1, 1]} : vector<2x128xf32> to vector<2x32xf32>
    %114 = arith.negf %113 : vector<2x32xf32>
    %115 = math.exp %114 : vector<2x32xf32>
    %cst_33 = arith.constant 1.000000e+00 : f32
    %116 = vector.broadcast %cst_33 : f32 to vector<2x32xf32>
    %117 = arith.addf %116, %115 : vector<2x32xf32>
    %118 = arith.divf %116, %117 : vector<2x32xf32>
    %119 = vector.extract_strided_slice %112 {offsets = [0, 32], sizes = [2, 32], strides = [1, 1]} : vector<2x128xf32> to vector<2x32xf32>
    %120 = arith.negf %119 : vector<2x32xf32>
    %121 = math.exp %120 : vector<2x32xf32>
    %cst_34 = arith.constant 1.000000e+00 : f32
    %122 = vector.broadcast %cst_34 : f32 to vector<2x32xf32>
    %123 = arith.addf %122, %121 : vector<2x32xf32>
    %124 = arith.divf %122, %123 : vector<2x32xf32>
    %125 = vector.extract_strided_slice %112 {offsets = [0, 64], sizes = [2, 32], strides = [1, 1]} : vector<2x128xf32> to vector<2x32xf32>
    %126 = math.tanh %125 : vector<2x32xf32>
    %127 = vector.extract_strided_slice %112 {offsets = [0, 96], sizes = [2, 32], strides = [1, 1]} : vector<2x128xf32> to vector<2x32xf32>
    %128 = arith.negf %127 : vector<2x32xf32>
    %129 = math.exp %128 : vector<2x32xf32>
    %cst_35 = arith.constant 1.000000e+00 : f32
    %130 = vector.broadcast %cst_35 : f32 to vector<2x32xf32>
    %131 = arith.addf %130, %129 : vector<2x32xf32>
    %132 = arith.divf %130, %131 : vector<2x32xf32>
    %133 = arith.mulf %124, %101 : vector<2x32xf32>
    %134 = arith.mulf %118, %126 : vector<2x32xf32>
    %135 = arith.addf %133, %134 : vector<2x32xf32>
    %136 = math.tanh %135 : vector<2x32xf32>
    %137 = arith.mulf %132, %136 : vector<2x32xf32>
    %138 = arith.index_cast %c3_i32 : i32 to index
    %c0_36 = arith.constant 0 : index
    %c0_37 = arith.constant 0 : index
    %139 = vector.load %arg5[%138, %c0_36, %c0_37] : memref<8x2x32xf32, #tpu.memory_space<vmem>>, vector<1x2x32xf32>
    %140 = vector.shape_cast %139 : vector<1x2x32xf32> to vector<2x32xf32>
    %141 = vector.shape_cast %137 : vector<2x32xf32> to vector<1x2x32xf32>
    tpu.vector_store %arg5[%138, %c0_36, %c0_37], %141 {strides = array<i32>} : memref<8x2x32xf32, #tpu.memory_space<vmem>>, vector<1x2x32xf32>,
    %c4_i32 = arith.constant 4 : i32
    %142 = arith.index_cast %c4_i32 : i32 to index
    %c0_38 = arith.constant 0 : index
    %c0_39 = arith.constant 0 : index
    %143 = vector.load %arg1[%142, %c0_38, %c0_39] : memref<8x2x128xf32, #tpu.memory_space<vmem>>, vector<1x2x128xf32>
    %144 = vector.shape_cast %143 : vector<1x2x128xf32> to vector<2x128xf32>
    %cst_40 = arith.constant dense<0.000000e+00> : vector<2x128xf32>
    %145 = tpu.matmul %137, %3, %cst_40 {dimension_numbers = #tpu.dot_dimension_numbers<[1], [0], [0], [1], [0, 0, 1, 1], [], []>} : vector<2x32xf32>, vector<32x128xf32>, vector<2x128xf32> -> vector<2x128xf32>
    %146 = arith.addf %144, %145 : vector<2x128xf32>
    %147 = vector.extract_strided_slice %146 {offsets = [0, 0], sizes = [2, 32], strides = [1, 1]} : vector<2x128xf32> to vector<2x32xf32>
    %148 = arith.negf %147 : vector<2x32xf32>
    %149 = math.exp %148 : vector<2x32xf32>
    %cst_41 = arith.constant 1.000000e+00 : f32
    %150 = vector.broadcast %cst_41 : f32 to vector<2x32xf32>
    %151 = arith.addf %150, %149 : vector<2x32xf32>
    %152 = arith.divf %150, %151 : vector<2x32xf32>
    %153 = vector.extract_strided_slice %146 {offsets = [0, 32], sizes = [2, 32], strides = [1, 1]} : vector<2x128xf32> to vector<2x32xf32>
    %154 = arith.negf %153 : vector<2x32xf32>
    %155 = math.exp %154 : vector<2x32xf32>
    %cst_42 = arith.constant 1.000000e+00 : f32
    %156 = vector.broadcast %cst_42 : f32 to vector<2x32xf32>
    %157 = arith.addf %156, %155 : vector<2x32xf32>
    %158 = arith.divf %156, %157 : vector<2x32xf32>
    %159 = vector.extract_strided_slice %146 {offsets = [0, 64], sizes = [2, 32], strides = [1, 1]} : vector<2x128xf32> to vector<2x32xf32>
    %160 = math.tanh %159 : vector<2x32xf32>
    %161 = vector.extract_strided_slice %146 {offsets = [0, 96], sizes = [2, 32], strides = [1, 1]} : vector<2x128xf32> to vector<2x32xf32>
    %162 = arith.negf %161 : vector<2x32xf32>
    %163 = math.exp %162 : vector<2x32xf32>
    %cst_43 = arith.constant 1.000000e+00 : f32
    %164 = vector.broadcast %cst_43 : f32 to vector<2x32xf32>
    %165 = arith.addf %164, %163 : vector<2x32xf32>
    %166 = arith.divf %164, %165 : vector<2x32xf32>
    %167 = arith.mulf %158, %135 : vector<2x32xf32>
    %168 = arith.mulf %152, %160 : vector<2x32xf32>
    %169 = arith.addf %167, %168 : vector<2x32xf32>
    %170 = math.tanh %169 : vector<2x32xf32>
    %171 = arith.mulf %166, %170 : vector<2x32xf32>
    %172 = arith.index_cast %c4_i32 : i32 to index
    %c0_44 = arith.constant 0 : index
    %c0_45 = arith.constant 0 : index
    %173 = vector.load %arg5[%172, %c0_44, %c0_45] : memref<8x2x32xf32, #tpu.memory_space<vmem>>, vector<1x2x32xf32>
    %174 = vector.shape_cast %173 : vector<1x2x32xf32> to vector<2x32xf32>
    %175 = vector.shape_cast %171 : vector<2x32xf32> to vector<1x2x32xf32>
    tpu.vector_store %arg5[%172, %c0_44, %c0_45], %175 {strides = array<i32>} : memref<8x2x32xf32, #tpu.memory_space<vmem>>, vector<1x2x32xf32>,
    %c5_i32 = arith.constant 5 : i32
    %176 = arith.index_cast %c5_i32 : i32 to index
    %c0_46 = arith.constant 0 : index
    %c0_47 = arith.constant 0 : index
    %177 = vector.load %arg1[%176, %c0_46, %c0_47] : memref<8x2x128xf32, #tpu.memory_space<vmem>>, vector<1x2x128xf32>
    %178 = vector.shape_cast %177 : vector<1x2x128xf32> to vector<2x128xf32>
    %cst_48 = arith.constant dense<0.000000e+00> : vector<2x128xf32>
    %179 = tpu.matmul %171, %3, %cst_48 {dimension_numbers = #tpu.dot_dimension_numbers<[1], [0], [0], [1], [0, 0, 1, 1], [], []>} : vector<2x32xf32>, vector<32x128xf32>, vector<2x128xf32> -> vector<2x128xf32>
    %180 = arith.addf %178, %179 : vector<2x128xf32>
    %181 = vector.extract_strided_slice %180 {offsets = [0, 0], sizes = [2, 32], strides = [1, 1]} : vector<2x128xf32> to vector<2x32xf32>
    %182 = arith.negf %181 : vector<2x32xf32>
    %183 = math.exp %182 : vector<2x32xf32>
    %cst_49 = arith.constant 1.000000e+00 : f32
    %184 = vector.broadcast %cst_49 : f32 to vector<2x32xf32>
    %185 = arith.addf %184, %183 : vector<2x32xf32>
    %186 = arith.divf %184, %185 : vector<2x32xf32>
    %187 = vector.extract_strided_slice %180 {offsets = [0, 32], sizes = [2, 32], strides = [1, 1]} : vector<2x128xf32> to vector<2x32xf32>
    %188 = arith.negf %187 : vector<2x32xf32>
    %189 = math.exp %188 : vector<2x32xf32>
    %cst_50 = arith.constant 1.000000e+00 : f32
    %190 = vector.broadcast %cst_50 : f32 to vector<2x32xf32>
    %191 = arith.addf %190, %189 : vector<2x32xf32>
    %192 = arith.divf %190, %191 : vector<2x32xf32>
    %193 = vector.extract_strided_slice %180 {offsets = [0, 64], sizes = [2, 32], strides = [1, 1]} : vector<2x128xf32> to vector<2x32xf32>
    %194 = math.tanh %193 : vector<2x32xf32>
    %195 = vector.extract_strided_slice %180 {offsets = [0, 96], sizes = [2, 32], strides = [1, 1]} : vector<2x128xf32> to vector<2x32xf32>
    %196 = arith.negf %195 : vector<2x32xf32>
    %197 = math.exp %196 : vector<2x32xf32>
    %cst_51 = arith.constant 1.000000e+00 : f32
    %198 = vector.broadcast %cst_51 : f32 to vector<2x32xf32>
    %199 = arith.addf %198, %197 : vector<2x32xf32>
    %200 = arith.divf %198, %199 : vector<2x32xf32>
    %201 = arith.mulf %192, %169 : vector<2x32xf32>
    %202 = arith.mulf %186, %194 : vector<2x32xf32>
    %203 = arith.addf %201, %202 : vector<2x32xf32>
    %204 = math.tanh %203 : vector<2x32xf32>
    %205 = arith.mulf %200, %204 : vector<2x32xf32>
    %206 = arith.index_cast %c5_i32 : i32 to index
    %c0_52 = arith.constant 0 : index
    %c0_53 = arith.constant 0 : index
    %207 = vector.load %arg5[%206, %c0_52, %c0_53] : memref<8x2x32xf32, #tpu.memory_space<vmem>>, vector<1x2x32xf32>
    %208 = vector.shape_cast %207 : vector<1x2x32xf32> to vector<2x32xf32>
    %209 = vector.shape_cast %205 : vector<2x32xf32> to vector<1x2x32xf32>
    tpu.vector_store %arg5[%206, %c0_52, %c0_53], %209 {strides = array<i32>} : memref<8x2x32xf32, #tpu.memory_space<vmem>>, vector<1x2x32xf32>,
    %c6_i32 = arith.constant 6 : i32
    %210 = arith.index_cast %c6_i32 : i32 to index
    %c0_54 = arith.constant 0 : index
    %c0_55 = arith.constant 0 : index
    %211 = vector.load %arg1[%210, %c0_54, %c0_55] : memref<8x2x128xf32, #tpu.memory_space<vmem>>, vector<1x2x128xf32>
    %212 = vector.shape_cast %211 : vector<1x2x128xf32> to vector<2x128xf32>
    %cst_56 = arith.constant dense<0.000000e+00> : vector<2x128xf32>
    %213 = tpu.matmul %205, %3, %cst_56 {dimension_numbers = #tpu.dot_dimension_numbers<[1], [0], [0], [1], [0, 0, 1, 1], [], []>} : vector<2x32xf32>, vector<32x128xf32>, vector<2x128xf32> -> vector<2x128xf32>
    %214 = arith.addf %212, %213 : vector<2x128xf32>
    %215 = vector.extract_strided_slice %214 {offsets = [0, 0], sizes = [2, 32], strides = [1, 1]} : vector<2x128xf32> to vector<2x32xf32>
    %216 = arith.negf %215 : vector<2x32xf32>
    %217 = math.exp %216 : vector<2x32xf32>
    %cst_57 = arith.constant 1.000000e+00 : f32
    %218 = vector.broadcast %cst_57 : f32 to vector<2x32xf32>
    %219 = arith.addf %218, %217 : vector<2x32xf32>
    %220 = arith.divf %218, %219 : vector<2x32xf32>
    %221 = vector.extract_strided_slice %214 {offsets = [0, 32], sizes = [2, 32], strides = [1, 1]} : vector<2x128xf32> to vector<2x32xf32>
    %222 = arith.negf %221 : vector<2x32xf32>
    %223 = math.exp %222 : vector<2x32xf32>
    %cst_58 = arith.constant 1.000000e+00 : f32
    %224 = vector.broadcast %cst_58 : f32 to vector<2x32xf32>
    %225 = arith.addf %224, %223 : vector<2x32xf32>
    %226 = arith.divf %224, %225 : vector<2x32xf32>
    %227 = vector.extract_strided_slice %214 {offsets = [0, 64], sizes = [2, 32], strides = [1, 1]} : vector<2x128xf32> to vector<2x32xf32>
    %228 = math.tanh %227 : vector<2x32xf32>
    %229 = vector.extract_strided_slice %214 {offsets = [0, 96], sizes = [2, 32], strides = [1, 1]} : vector<2x128xf32> to vector<2x32xf32>
    %230 = arith.negf %229 : vector<2x32xf32>
    %231 = math.exp %230 : vector<2x32xf32>
    %cst_59 = arith.constant 1.000000e+00 : f32
    %232 = vector.broadcast %cst_59 : f32 to vector<2x32xf32>
    %233 = arith.addf %232, %231 : vector<2x32xf32>
    %234 = arith.divf %232, %233 : vector<2x32xf32>
    %235 = arith.mulf %226, %203 : vector<2x32xf32>
    %236 = arith.mulf %220, %228 : vector<2x32xf32>
    %237 = arith.addf %235, %236 : vector<2x32xf32>
    %238 = math.tanh %237 : vector<2x32xf32>
    %239 = arith.mulf %234, %238 : vector<2x32xf32>
    %240 = arith.index_cast %c6_i32 : i32 to index
    %c0_60 = arith.constant 0 : index
    %c0_61 = arith.constant 0 : index
    %241 = vector.load %arg5[%240, %c0_60, %c0_61] : memref<8x2x32xf32, #tpu.memory_space<vmem>>, vector<1x2x32xf32>
    %242 = vector.shape_cast %241 : vector<1x2x32xf32> to vector<2x32xf32>
    %243 = vector.shape_cast %239 : vector<2x32xf32> to vector<1x2x32xf32>
    tpu.vector_store %arg5[%240, %c0_60, %c0_61], %243 {strides = array<i32>} : memref<8x2x32xf32, #tpu.memory_space<vmem>>, vector<1x2x32xf32>,
    %c7_i32 = arith.constant 7 : i32
    %244 = arith.index_cast %c7_i32 : i32 to index
    %c0_62 = arith.constant 0 : index
    %c0_63 = arith.constant 0 : index
    %245 = vector.load %arg1[%244, %c0_62, %c0_63] : memref<8x2x128xf32, #tpu.memory_space<vmem>>, vector<1x2x128xf32>
    %246 = vector.shape_cast %245 : vector<1x2x128xf32> to vector<2x128xf32>
    %cst_64 = arith.constant dense<0.000000e+00> : vector<2x128xf32>
    %247 = tpu.matmul %239, %3, %cst_64 {dimension_numbers = #tpu.dot_dimension_numbers<[1], [0], [0], [1], [0, 0, 1, 1], [], []>} : vector<2x32xf32>, vector<32x128xf32>, vector<2x128xf32> -> vector<2x128xf32>
    %248 = arith.addf %246, %247 : vector<2x128xf32>
    %249 = vector.extract_strided_slice %248 {offsets = [0, 0], sizes = [2, 32], strides = [1, 1]} : vector<2x128xf32> to vector<2x32xf32>
    %250 = arith.negf %249 : vector<2x32xf32>
    %251 = math.exp %250 : vector<2x32xf32>
    %cst_65 = arith.constant 1.000000e+00 : f32
    %252 = vector.broadcast %cst_65 : f32 to vector<2x32xf32>
    %253 = arith.addf %252, %251 : vector<2x32xf32>
    %254 = arith.divf %252, %253 : vector<2x32xf32>
    %255 = vector.extract_strided_slice %248 {offsets = [0, 32], sizes = [2, 32], strides = [1, 1]} : vector<2x128xf32> to vector<2x32xf32>
    %256 = arith.negf %255 : vector<2x32xf32>
    %257 = math.exp %256 : vector<2x32xf32>
    %cst_66 = arith.constant 1.000000e+00 : f32
    %258 = vector.broadcast %cst_66 : f32 to vector<2x32xf32>
    %259 = arith.addf %258, %257 : vector<2x32xf32>
    %260 = arith.divf %258, %259 : vector<2x32xf32>
    %261 = vector.extract_strided_slice %248 {offsets = [0, 64], sizes = [2, 32], strides = [1, 1]} : vector<2x128xf32> to vector<2x32xf32>
    %262 = math.tanh %261 : vector<2x32xf32>
    %263 = vector.extract_strided_slice %248 {offsets = [0, 96], sizes = [2, 32], strides = [1, 1]} : vector<2x128xf32> to vector<2x32xf32>
    %264 = arith.negf %263 : vector<2x32xf32>
    %265 = math.exp %264 : vector<2x32xf32>
    %cst_67 = arith.constant 1.000000e+00 : f32
    %266 = vector.broadcast %cst_67 : f32 to vector<2x32xf32>
    %267 = arith.addf %266, %265 : vector<2x32xf32>
    %268 = arith.divf %266, %267 : vector<2x32xf32>
    %269 = arith.mulf %260, %237 : vector<2x32xf32>
    %270 = arith.mulf %254, %262 : vector<2x32xf32>
    %271 = arith.addf %269, %270 : vector<2x32xf32>
    %272 = math.tanh %271 : vector<2x32xf32>
    %273 = arith.mulf %268, %272 : vector<2x32xf32>
    %274 = arith.index_cast %c7_i32 : i32 to index
    %c0_68 = arith.constant 0 : index
    %c0_69 = arith.constant 0 : index
    %275 = vector.load %arg5[%274, %c0_68, %c0_69] : memref<8x2x32xf32, #tpu.memory_space<vmem>>, vector<1x2x32xf32>
    %276 = vector.shape_cast %275 : vector<1x2x32xf32> to vector<2x32xf32>
    %277 = vector.shape_cast %273 : vector<2x32xf32> to vector<1x2x32xf32>
    tpu.vector_store %arg5[%274, %c0_68, %c0_69], %277 {strides = array<i32>} : memref<8x2x32xf32, #tpu.memory_space<vmem>>, vector<1x2x32xf32>,
    %c8_i32 = arith.constant 8 : i32
    %c0_70 = arith.constant 0 : index
    %c0_71 = arith.constant 0 : index
    %278 = vector.load %arg8[%c0_70, %c0_71] : memref<2x32xf32, #tpu.memory_space<vmem>>, vector<2x32xf32>
    tpu.vector_store %arg8[%c0_70, %c0_71], %273 {strides = array<i32>} : memref<2x32xf32, #tpu.memory_space<vmem>>, vector<2x32xf32>,
    %c0_72 = arith.constant 0 : index
    %c0_73 = arith.constant 0 : index
    %279 = vector.load %arg9[%c0_72, %c0_73] : memref<2x32xf32, #tpu.memory_space<vmem>>, vector<2x32xf32>
    tpu.vector_store %arg9[%c0_72, %c0_73], %271 {strides = array<i32>} : memref<2x32xf32, #tpu.memory_space<vmem>>, vector<2x32xf32>,
    %c0_i32_74 = arith.constant 0 : i32
    %280 = arith.cmpi eq, %arg0, %c0_i32_74 : i32
    %281 = arith.extui %280 : i1 to i32
    %c0_i32_75 = arith.constant 0 : i32
    %282 = arith.cmpi ne, %281, %c0_i32_75 : i32
    scf.if %282 {
      %c0_76 = arith.constant 0 : index
      %c0_77 = arith.constant 0 : index
      %283 = vector.load %arg6[%c0_76, %c0_77] : memref<2x32xf32, #tpu.memory_space<vmem>>, vector<2x32xf32>
      tpu.vector_store %arg6[%c0_76, %c0_77], %273 {strides = array<i32>} : memref<2x32xf32, #tpu.memory_space<vmem>>, vector<2x32xf32>,
      %c0_78 = arith.constant 0 : index
      %c0_79 = arith.constant 0 : index
      %284 = vector.load %arg7[%c0_78, %c0_79] : memref<2x32xf32, #tpu.memory_space<vmem>>, vector<2x32xf32>
      tpu.vector_store %arg7[%c0_78, %c0_79], %271 {strides = array<i32>} : memref<2x32xf32, #tpu.memory_space<vmem>>, vector<2x32xf32>,
    } else {
    }
    return
  }
  func.func @transform_0(%arg0: i32) -> (i32, i32, i32) {
    %c0_i32 = arith.constant 0 : i32
    %c0_i32_0 = arith.constant 0 : i32
    %c0_i32_1 = arith.constant 0 : i32
    return %arg0, %c0_i32, %c0_i32_0 : i32, i32, i32
  }
  func.func @transform_1(%arg0: i32) -> (i32, i32) {
    %c0_i32 = arith.constant 0 : i32
    %c0_i32_0 = arith.constant 0 : i32
    %c0_i32_1 = arith.constant 0 : i32
    return %c0_i32, %c0_i32_0 : i32, i32
  }
  func.func @transform_2(%arg0: i32) -> (i32, i32) {
    %c0_i32 = arith.constant 0 : i32
    %c0_i32_0 = arith.constant 0 : i32
    %c0_i32_1 = arith.constant 0 : i32
    return %c0_i32, %c0_i32_0 : i32, i32
  }
  func.func @transform_3(%arg0: i32) -> (i32, i32) {
    %c0_i32 = arith.constant 0 : i32
    %c0_i32_0 = arith.constant 0 : i32
    %c0_i32_1 = arith.constant 0 : i32
    return %c0_i32, %c0_i32_0 : i32, i32
  }
  func.func @transform_4(%arg0: i32) -> (i32, i32, i32) {
    %c0_i32 = arith.constant 0 : i32
    %c0_i32_0 = arith.constant 0 : i32
    %c0_i32_1 = arith.constant 0 : i32
    return %arg0, %c0_i32, %c0_i32_0 : i32, i32, i32
  }
  func.func @transform_5(%arg0: i32) -> (i32, i32) {
    %c0_i32 = arith.constant 0 : i32
    %c0_i32_0 = arith.constant 0 : i32
    %c0_i32_1 = arith.constant 0 : i32
    return %c0_i32, %c0_i32_0 : i32, i32
  }
  func.func @transform_6(%arg0: i32) -> (i32, i32) {
    %c0_i32 = arith.constant 0 : i32
    %c0_i32_0 = arith.constant 0 : i32
    %c0_i32_1 = arith.constant 0 : i32
    return %c0_i32, %c0_i32_0 : i32, i32
  }
}

module attributes {stable_mosaic.version = 11 : i64} {
  func.func @_linear_kernel(%arg0: i32, %arg1: memref<16x64xf32, #tpu.memory_space<vmem>>, %arg2: memref<64x256xf32, #tpu.memory_space<vmem>>, %arg3: memref<1x256xf32, #tpu.memory_space<vmem>>, %arg4: memref<16x256xf32, #tpu.memory_space<vmem>>) attributes {dimension_semantics = [#tpu.dimension_semantics<parallel>], iteration_bounds = array<i64: 1>, scalar_prefetch = 0 : i64, scratch_operands = 0 : i64, tpu.core_type = #tpu.core_type<tc>, window_params = [{transform_indices = @transform_0, window_bounds = array<i64: 16, 64>}, {pipeline_mode = #tpu.pipeline_mode<synchronous>, transform_indices = @transform_1, window_bounds = array<i64: 64, 256>}, {pipeline_mode = #tpu.pipeline_mode<synchronous>, transform_indices = @transform_2, window_bounds = array<i64: 1, 256>}, {transform_indices = @transform_3, window_bounds = array<i64: 16, 256>}]} {
    %c0 = arith.constant 0 : index
    %c0_0 = arith.constant 0 : index
    %0 = vector.load %arg1[%c0, %c0_0] : memref<16x64xf32, #tpu.memory_space<vmem>>, vector<16x64xf32>
    %c0_1 = arith.constant 0 : index
    %c0_2 = arith.constant 0 : index
    %1 = vector.load %arg2[%c0_1, %c0_2] : memref<64x256xf32, #tpu.memory_space<vmem>>, vector<64x256xf32>
    %cst = arith.constant dense<0.000000e+00> : vector<16x256xf32>
    %2 = tpu.matmul %0, %1, %cst {dimension_numbers = #tpu.dot_dimension_numbers<[1], [0], [0], [1], [0, 0, 1, 1], [], []>} : vector<16x64xf32>, vector<64x256xf32>, vector<16x256xf32> -> vector<16x256xf32>
    %c0_3 = arith.constant 0 : index
    %c0_4 = arith.constant 0 : index
    %3 = vector.load %arg3[%c0_3, %c0_4] : memref<1x256xf32, #tpu.memory_space<vmem>>, vector<1x256xf32>
    %4 = vector.broadcast %3 : vector<1x256xf32> to vector<16x256xf32>
    %5 = arith.addf %2, %4 : vector<16x256xf32>
    %c0_5 = arith.constant 0 : index
    %c0_6 = arith.constant 0 : index
    %6 = vector.load %arg4[%c0_5, %c0_6] : memref<16x256xf32, #tpu.memory_space<vmem>>, vector<16x256xf32>
    tpu.vector_store %arg4[%c0_5, %c0_6], %5 {strides = array<i32>} : memref<16x256xf32, #tpu.memory_space<vmem>>, vector<16x256xf32>,
    return
  }
  func.func @transform_0(%arg0: i32) -> (i32, i32) {
    %c0_i32 = arith.constant 0 : i32
    %c0_i32_0 = arith.constant 0 : i32
    return %arg0, %c0_i32 : i32, i32
  }
  func.func @transform_1(%arg0: i32) -> (i32, i32) {
    %c0_i32 = arith.constant 0 : i32
    %c0_i32_0 = arith.constant 0 : i32
    %c0_i32_1 = arith.constant 0 : i32
    return %c0_i32, %c0_i32_0 : i32, i32
  }
  func.func @transform_2(%arg0: i32) -> (i32, i32) {
    %c0_i32 = arith.constant 0 : i32
    %c0_i32_0 = arith.constant 0 : i32
    %c0_i32_1 = arith.constant 0 : i32
    return %c0_i32, %c0_i32_0 : i32, i32
  }
  func.func @transform_3(%arg0: i32) -> (i32, i32) {
    %c0_i32 = arith.constant 0 : i32
    %c0_i32_0 = arith.constant 0 : i32
    return %arg0, %c0_i32 : i32, i32
  }
}

module attributes {stable_mosaic.version = 11 : i64} {
  func.func @_linear_kernel(%arg0: i32, %arg1: memref<16x64xf32, #tpu.memory_space<vmem>>, %arg2: memref<64x32xf32, #tpu.memory_space<vmem>>, %arg3: memref<1x32xf32, #tpu.memory_space<vmem>>, %arg4: memref<16x32xf32, #tpu.memory_space<vmem>>) attributes {dimension_semantics = [#tpu.dimension_semantics<parallel>], iteration_bounds = array<i64: 1>, scalar_prefetch = 0 : i64, scratch_operands = 0 : i64, tpu.core_type = #tpu.core_type<tc>, window_params = [{transform_indices = @transform_0, window_bounds = array<i64: 16, 64>}, {pipeline_mode = #tpu.pipeline_mode<synchronous>, transform_indices = @transform_1, window_bounds = array<i64: 64, 32>}, {pipeline_mode = #tpu.pipeline_mode<synchronous>, transform_indices = @transform_2, window_bounds = array<i64: 1, 32>}, {transform_indices = @transform_3, window_bounds = array<i64: 16, 32>}]} {
    %c0 = arith.constant 0 : index
    %c0_0 = arith.constant 0 : index
    %0 = vector.load %arg1[%c0, %c0_0] : memref<16x64xf32, #tpu.memory_space<vmem>>, vector<16x64xf32>
    %c0_1 = arith.constant 0 : index
    %c0_2 = arith.constant 0 : index
    %1 = vector.load %arg2[%c0_1, %c0_2] : memref<64x32xf32, #tpu.memory_space<vmem>>, vector<64x32xf32>
    %cst = arith.constant dense<0.000000e+00> : vector<16x32xf32>
    %2 = tpu.matmul %0, %1, %cst {dimension_numbers = #tpu.dot_dimension_numbers<[1], [0], [0], [1], [0, 0, 1, 1], [], []>} : vector<16x64xf32>, vector<64x32xf32>, vector<16x32xf32> -> vector<16x32xf32>
    %c0_3 = arith.constant 0 : index
    %c0_4 = arith.constant 0 : index
    %3 = vector.load %arg3[%c0_3, %c0_4] : memref<1x32xf32, #tpu.memory_space<vmem>>, vector<1x32xf32>
    %4 = vector.broadcast %3 : vector<1x32xf32> to vector<16x32xf32>
    %5 = arith.addf %2, %4 : vector<16x32xf32>
    %c0_5 = arith.constant 0 : index
    %c0_6 = arith.constant 0 : index
    %6 = vector.load %arg4[%c0_5, %c0_6] : memref<16x32xf32, #tpu.memory_space<vmem>>, vector<16x32xf32>
    tpu.vector_store %arg4[%c0_5, %c0_6], %5 {strides = array<i32>} : memref<16x32xf32, #tpu.memory_space<vmem>>, vector<16x32xf32>,
    return
  }
  func.func @transform_0(%arg0: i32) -> (i32, i32) {
    %c0_i32 = arith.constant 0 : i32
    %c0_i32_0 = arith.constant 0 : i32
    return %arg0, %c0_i32 : i32, i32
  }
  func.func @transform_1(%arg0: i32) -> (i32, i32) {
    %c0_i32 = arith.constant 0 : i32
    %c0_i32_0 = arith.constant 0 : i32
    %c0_i32_1 = arith.constant 0 : i32
    return %c0_i32, %c0_i32_0 : i32, i32
  }
  func.func @transform_2(%arg0: i32) -> (i32, i32) {
    %c0_i32 = arith.constant 0 : i32
    %c0_i32_0 = arith.constant 0 : i32
    %c0_i32_1 = arith.constant 0 : i32
    return %c0_i32, %c0_i32_0 : i32, i32
  }
  func.func @transform_3(%arg0: i32) -> (i32, i32) {
    %c0_i32 = arith.constant 0 : i32
    %c0_i32_0 = arith.constant 0 : i32
    return %arg0, %c0_i32 : i32, i32
  }
}

</mosaic_0001>

<bundles_post_ra>
// kernel: blstm_forward.7
= control target key start
LH: loop header
LB: loop body
LE: loop exit
PB: predicated region body
PF: predicated region fallthrough
CT: control target
= control target key end

     0   :  { %v143_v3 = vmov 0.0   ;;  %vm36_vm0 = vcmask 261120   ;;  %v26_v15 = vlaneseq  ;;  %s209_s1 = inlined_call_operand.vmem [shape: f32[32,256], index: 1, kind: input, shape index: {}]   ;;  %s210_s0 = inlined_call_operand.vmem [shape: f32[16,32], index: 0, kind: input, shape index: {}]   ;;  %s211_s2 = inlined_call_operand.vmem [shape: f32[1,256], index: 2, kind: input, shape index: {}]   ;;  %s212_s3 = inlined_call_operand.vmem [shape: f32[16,256], index: 3, kind: output, shape index: {}]  }
   0x1   :  { %v17_v0 = vld [vmem:[%s209_s1 + $0x8] sm:$0xff]  ;;  %v19_v1 = vld [vmem:[%s209_s1 + $0x18] sm:$0xff]  ;;  %v16_v2 = vld [vmem:[%s209_s1] sm:$0xff]  ;;  %107 = vmatprep.mubr.f32.mxu0 %v143_v3  ;;  %113 = vmatprep.mubr.f32.mxu1 %v143_v3 }
   0x2   :  { %v130_v4 = vpack.c.bf16 %v19_v1, %v17_v0  ;;  %v18_v5 = vld [vmem:[%s209_s1 + $0x10] sm:$0xff]  ;;  %v21_v6 = vld [vmem:[%s209_s1 + $0x28] sm:$0xff]  ;;  %v23_v7 = vld [vmem:[%s209_s1 + $0x38] sm:$0xff]  ;;  %v27_v16 = vshrl.u32 %v26_v15, 7 }
   0x3   :  { %v132_v8 = vpack.c.bf16 %v18_v5, %v16_v2  ;;  %v134_v9 = vpack.c.bf16 %v23_v7, %v21_v6  ;;  %v20_v10 = vld [vmem:[%s209_s1 + $0x20] sm:$0xff]  ;;  %v22_v11 = vld [vmem:[%s209_s1 + $0x30] sm:$0xff]  ;;  %v15_v14 = vld [vmem:[%s210_s0 + $0x8] sm:$0xff] }
   0x4   :  { %131 = vmatprep.subr.bf16.mxu0 %v130_v4  ;;  %138 = vmatprep.subr.bf16.mxu1 %v130_v4  ;;  %v136_v12 = vpack.c.bf16 %v22_v11, %v20_v10  ;;  %v14_v13 = vld [vmem:[%s210_s0] sm:$0xff]  ;;  %v28_v17 = vsub.s32 0, %v27_v16  ;;  %v32_v19 = vsub.s32 1, %v27_v16 }
   0x5   :  { %133 = vmatpush1.bf16.msra.mxu0 %v132_v8  ;;  %140 = vmatpush1.bf16.msra.mxu1 %v132_v8  ;;  %v24_v18 = vld [vmem:[%s211_s2] sm:$0x3] }
   0x6   :  { %135 = vmatprep.subr.bf16.mxu0 %v134_v9  ;;  %139 = vmatprep.subr.bf16.mxu1 %v134_v9  ;;  %v29_v20 = vrot.slane %v24_v18, %v28_v17  ;;  %v33_v21 = vrot.slane %v24_v18, %v32_v19 }
   0x9   :  { %137 = vmatpush1.bf16.msra.mxu0 %v136_v12  ;;  %141 = vmatpush1.bf16.msra.mxu1 %v136_v12 }
   0xc   :  { %128 = vmatmul.mubr.msk.f32.vlgmr.msra.gmra.mrb[0].mxu0 %vm36_vm0, %v14_v13  ;;  %129 = vmatmul.mubr.msk.f32.vlgmr.msra.gmra.mrb[0].mxu1 %vm36_vm0, %v15_v14 }
  0xdf   :  { %v109_v22 = vpop.f32.mrb[0].mxu0  ;;  %v115_v23 = vpop.f32.mrb[0].mxu1 }
  0xe0   :  { %v110_v24 = vadd.f32 %v109_v22, %v29_v20  ;;  %v116_v25 = vadd.f32 %v115_v23, %v29_v20  ;;  %v111_v26 = vpop.f32.mrb[1].mxu0  ;;  %v117_v27 = vpop.f32.mrb[1].mxu1 }
  0xe1   :  { %v112_v28 = vadd.f32 %v111_v26, %v33_v21  ;;  %v118_v29 = vadd.f32 %v117_v27, %v33_v21 }
  0xe2   :  { %120 = vst [vmem:[%s212_s3] sm:$0xff] %v110_v24  ;;  %122 = vst [vmem:[%s212_s3 + $0x10] sm:$0xff] %v116_v25 }
  0xe3   :  { %121 = vst [vmem:[%s212_s3 + $0x8] sm:$0xff] %v112_v28  ;;  %123 = vst [vmem:[%s212_s3 + $0x18] sm:$0xff] %v118_v29 }

// kernel: blstm_forward.10
= control target key start
LH: loop header
LB: loop body
LE: loop exit
PB: predicated region body
PF: predicated region fallthrough
CT: control target
= control target key end

     0   :  { %v163_v3 = vmov 0.0   ;;  %vm44_vm0 = vcmask 523264   ;;  %v34_v27 = vlaneseq  ;;  %s253_s1 = inlined_call_operand.vmem [shape: f32[64,256], index: 1, kind: input, shape index: {}]   ;;  %s254_s0 = inlined_call_operand.vmem [shape: f32[16,64], index: 0, kind: input, shape index: {}]   ;;  %s255_s2 = inlined_call_operand.vmem [shape: f32[1,256], index: 2, kind: input, shape index: {}]   ;;  %s256_s3 = inlined_call_operand.vmem [shape: f32[16,256], index: 3, kind: output, shape index: {}]  }
   0x1   :  { %v17_v0 = vld [vmem:[%s253_s1 + $0x8] sm:$0xff]  ;;  %v19_v1 = vld [vmem:[%s253_s1 + $0x18] sm:$0xff]  ;;  %v16_v2 = vld [vmem:[%s253_s1] sm:$0xff]  ;;  %115 = vmatprep.mubr.f32.mxu0 %v163_v3  ;;  %121 = vmatprep.mubr.f32.mxu1 %v163_v3 }
   0x2   :  { %v138_v4 = vpack.c.bf16 %v19_v1, %v17_v0  ;;  %v18_v5 = vld [vmem:[%s253_s1 + $0x10] sm:$0xff]  ;;  %v21_v6 = vld [vmem:[%s253_s1 + $0x28] sm:$0xff]  ;;  %v23_v7 = vld [vmem:[%s253_s1 + $0x38] sm:$0xff]  ;;  %v35_v28 = vshrl.u32 %v34_v27, 7 }
   0x3   :  { %v140_v8 = vpack.c.bf16 %v18_v5, %v16_v2  ;;  %v142_v9 = vpack.c.bf16 %v23_v7, %v21_v6  ;;  %v20_v10 = vld [vmem:[%s253_s1 + $0x20] sm:$0xff]  ;;  %v22_v11 = vld [vmem:[%s253_s1 + $0x30] sm:$0xff]  ;;  %v25_v12 = vld [vmem:[%s253_s1 + $0x48] sm:$0xff] }
   0x4   :  { %139 = vmatprep.subr.bf16.mxu0 %v138_v4  ;;  %154 = vmatprep.subr.bf16.mxu1 %v138_v4  ;;  %v27_v13 = vld [vmem:[%s253_s1 + $0x58] sm:$0xff]  ;;  %v144_v14 = vpack.c.bf16 %v22_v11, %v20_v10  ;;  %v24_v16 = vld [vmem:[%s253_s1 + $0x40] sm:$0xff]  ;;  %v26_v17 = vld [vmem:[%s253_s1 + $0x50] sm:$0xff]  ;;  %v36_v29 = vsub.s32 0, %v35_v28  ;;  %v40_v31 = vsub.s32 1, %v35_v28 }
   0x5   :  { %141 = vmatpush1.bf16.msra.mxu0 %v140_v8  ;;  %158 = vmatpush1.bf16.msra.mxu1 %v140_v8  ;;  %v146_v15 = vpack.c.bf16 %v27_v13, %v25_v12  ;;  %v29_v18 = vld [vmem:[%s253_s1 + $0x68] sm:$0xff]  ;;  %v31_v19 = vld [vmem:[%s253_s1 + $0x78] sm:$0xff]  ;;  %v148_v20 = vpack.c.bf16 %v26_v17, %v24_v16  ;;  %v28_v22 = vld [vmem:[%s253_s1 + $0x60] sm:$0xff] }
   0x6   :  { %143 = vmatprep.subr.bf16.mxu0 %v142_v9  ;;  %155 = vmatprep.subr.bf16.mxu1 %v142_v9  ;;  %v150_v21 = vpack.c.bf16 %v31_v19, %v29_v18  ;;  %v30_v23 = vld [vmem:[%s253_s1 + $0x70] sm:$0xff]  ;;  %v14_v25 = vld [vmem:[%s254_s0] sm:$0xff]  ;;  %v15_v26 = vld [vmem:[%s254_s0 + $0x8] sm:$0xff] }
   0x7   :  { %v152_v24 = vpack.c.bf16 %v30_v23, %v28_v22  ;;  %v32_v30 = vld [vmem:[%s255_s2] sm:$0x3] }
   0x8   :  { %v37_v32 = vrot.slane %v32_v30, %v36_v29  ;;  %v41_v33 = vrot.slane %v32_v30, %v40_v31 }
   0x9   :  { %145 = vmatpush1.bf16.msra.mxu0 %v144_v14  ;;  %159 = vmatpush1.bf16.msra.mxu1 %v144_v14 }
   0xa   :  { %147 = vmatprep.subr.bf16.mxu0 %v146_v15  ;;  %156 = vmatprep.subr.bf16.mxu1 %v146_v15 }
   0xd   :  { %149 = vmatpush1.bf16.msra.mxu0 %v148_v20  ;;  %160 = vmatpush1.bf16.msra.mxu1 %v148_v20 }
   0xe   :  { %151 = vmatprep.subr.bf16.mxu0 %v150_v21  ;;  %157 = vmatprep.subr.bf16.mxu1 %v150_v21 }
  0x11   :  { %153 = vmatpush1.bf16.msra.mxu0 %v152_v24  ;;  %161 = vmatpush1.bf16.msra.mxu1 %v152_v24 }
  0x14   :  { %136 = vmatmul.mubr.msk.f32.vlgmr.msra.gmra.mrb[0].mxu0 %vm44_vm0, %v14_v25  ;;  %137 = vmatmul.mubr.msk.f32.vlgmr.msra.gmra.mrb[0].mxu1 %vm44_vm0, %v15_v26 }
  0xe7   :  { %v117_v34 = vpop.f32.mrb[0].mxu0  ;;  %v123_v35 = vpop.f32.mrb[0].mxu1 }
  0xe8   :  { %v118_v36 = vadd.f32 %v117_v34, %v37_v32  ;;  %v124_v37 = vadd.f32 %v123_v35, %v37_v32  ;;  %v119_v38 = vpop.f32.mrb[1].mxu0  ;;  %v125_v39 = vpop.f32.mrb[1].mxu1 }
  0xe9   :  { %v120_v40 = vadd.f32 %v119_v38, %v41_v33  ;;  %v126_v41 = vadd.f32 %v125_v39, %v41_v33 }
  0xea   :  { %128 = vst [vmem:[%s256_s3] sm:$0xff] %v118_v36  ;;  %130 = vst [vmem:[%s256_s3 + $0x10] sm:$0xff] %v124_v37 }
  0xeb   :  { %129 = vst [vmem:[%s256_s3 + $0x8] sm:$0xff] %v120_v40  ;;  %131 = vst [vmem:[%s256_s3 + $0x18] sm:$0xff] %v126_v41 }

// kernel: blstm_forward.9
= control target key start
LH: loop header
LB: loop body
LE: loop exit
PB: predicated region body
PF: predicated region fallthrough
CT: control target
= control target key end

     0   :  { %v1301_v3 = vmov 0.0|0.0   ;;  %vm1302_vm0 = vmmov 0   ;;  %v1303_v6 = vmov 0.0   ;;  %vm116_vm1 = vcmask 254976   ;;  %s1304_s9 = smov 64   ;;  %s1305_s10 = smov 32   ;;  %s1521_s0 = inlined_call_operand.vmem [shape: f32[8,2,256], index: 0, kind: input, shape index: {}]   ;;  %s1522_s1 = inlined_call_operand.vmem [shape: f32[32,128], index: 1, kind: input, shape index: {}]   ;;  %s1523_s2 = inlined_call_operand.vmem [shape: f32[2,32], index: 2, kind: input, shape index: {}, may-alias: {2,3}]   ;;  %s1524_s3 = inlined_call_operand.vmem [shape: f32[2,32], index: 3, kind: input, shape index: {}, may-alias: {2,3}]   ;;  %s1525_s4 = inlined_call_operand.vmem [shape: f32[8,2,32], index: 4, kind: output, shape index: {0}]   ;;  %s1526_s5 = inlined_call_operand.vmem [shape: f32[2,32], index: 5, kind: output, shape index: {1}]   ;;  %s1527_s6 = inlined_call_operand.vmem [shape: f32[2,32], index: 6, kind: output, shape index: {2}]  }
   0x1   :  { %v120_v0 = vld [vmem:[%s1522_s1] sm:$0xff]  ;;  %v121_v1 = vld [vmem:[%s1522_s1 + $0x8] sm:$0xff]  ;;  %v122_v2 = vld [vmem:[%s1522_s1 + $0x10] sm:$0xff]  ;;  %1183 = vmatprep.subr.bf16.mxu0 %v1301_v3  ;;  %1103 = vmatprep.mubr.msk.f32.mxu0 %vm1302_vm0, %v1303_v6  ;;  %vm128_vm2 = vcmask 261120  }
   0x2   :  { %v1352_v4 = vpack.c.bf16 %v121_v1, %v120_v0  ;;  %v123_v5 = vld [vmem:[%s1522_s1 + $0x18] sm:$0xff]  ;;  %v115_v7 = vld [vmem:[%s1523_s2] sm:$0x3]  ;;  %1189 = vmatprep.subr.bf16.mxu1 %v1301_v3  ;;  %1114 = vmatprep.mubr.msk.f32.mxu1 %vm1302_vm0, %v1303_v6  ;;  %v1029_v48 = vld [vmem:[%s1521_s0 + $0x16] sm:$0x3] }
   0x3   :  { %117 = vst.msk [vmem:[#allocation2] sm:$0x3] %vm116_vm1, %v115_v7  ;;  %v1031_v8 = vld [vmem:[%s1521_s0 + $0x1e] sm:$0x3]  ;;  %v1370_v9 = vpack.c.bf16 %v123_v5, %v122_v2  ;;  %v118_v11 = vld [vmem:[%s1524_s3] sm:$0x3] }
   0x4   :  { %1185 = vmatpush3.bf16.msra.mxu0 %v1352_v4  ;;  %50 = vst [vmem:[#allocation4 + $0xe] sm:$0x3] %v1031_v8  ;;  %1191 = vmatpush3.bf16.msra.mxu1 %v1352_v4  ;;  %119 = vst.msk [vmem:[#allocation3] sm:$0x3] %vm116_vm1, %v118_v11  ;;  %v1030_v29 = vld [vmem:[%s1521_s0 + $0x1a] sm:$0x3] }
   0x5   :  { %1186 = vmatprep.subr.bf16.mxu0 %v1301_v3  ;;  %1192 = vmatprep.subr.bf16.mxu1 %v1301_v3  ;;  %48 = vst [vmem:[#allocation4 + $0xc] sm:$0x3] %v1030_v29  ;;  %46 = vst [vmem:[#allocation4 + $0xa] sm:$0x3] %v1029_v48  ;;  %v1028_v5 = vld [vmem:[%s1521_s0 + $0x12] sm:$0x3] }
   0x6   :  { %44 = vst [vmem:[#allocation4 + $0x8] sm:$0x3] %v1028_v5 }
   0x8   :  { %1188 = vmatpush3.bf16.msra.mxu0 %v1370_v9  ;;  %1194 = vmatpush3.bf16.msra.mxu1 %v1370_v9 }
   0x9   :  { %1195 = vmatprep.subr.bf16.mxu0 %v1301_v3  ;;  %1201 = vmatprep.subr.bf16.mxu1 %v1301_v3 }
   0xa   :  { %v124_v10 = vld [vmem:[#allocation2] sm:$0x3] }
   0xb   :  { %1104 = vmatmul.mubr.msk.f32.vlgmr.msra.gmra.mrb[0].mxu0 %vm128_vm2, %v124_v10  ;;  %v127_v12 = vld [vmem:[#allocation4 + $0xe] sm:$0x3]  ;;  %v125_v17 = vld [vmem:[#allocation3] sm:$0x3] }
   0xc   :  { %1197 = vmatpush3.bf16.msra.mxu0 %v1352_v4  ;;  %1125 = vmatprep.mubr.msk.f32.mxu0 %vm1302_vm0, %v1303_v6  ;;  %v239_v33 = vld [vmem:[#allocation4 + $0xc] sm:$0x3]  ;;  %v344_v52 = vld [vmem:[#allocation4 + $0xa] sm:$0x3] }
   0xd   :  { %1198 = vmatprep.subr.bf16.mxu0 %v1301_v3  ;;  %v449_v11 = vld [vmem:[#allocation4 + $0x8] sm:$0x3] }
  0x10   :  { %1200 = vmatpush3.bf16.msra.mxu0 %v1370_v9 }
  0x11   :  { %1207 = vmatprep.subr.bf16.mxu0 %v1301_v3 }
  0xde   :  { %v198_v13 = vpop.f32.mrb[0].mxu0 }
  0xdf   :  { %v202_v14 = vadd.f32 %v198_v13, %v127_v12  ;;  %v1105_v15 = vpop.f32.mrb[1].mxu0 }
  0xe1   :  { %1237 = vtanh.f32 %v202_v14  ;;  %v1033_v18 = vmul.f32 -1.442695, %v202_v14 }
  0xe3   :  { %1239 = vpow2.f32 %v1033_v18 }
  0xeb   :  { %v1238_v16 = vpop.eup %1237 }
  0xec   :  { %216 = vrot.lane.b32.xlu0 %v1238_v16, %s1304_s9 }
  0xed   :  { %v1240_v19 = vpop.eup %1239 }
  0xee   :  { %v206_v20 = vadd.f32 1.0, %v1240_v19 }
  0xf0   :  { %211 = vrot.lane.b32.xlu0 %v125_v17, %s1305_s10  ;;  %1241 = vrcp.f32 %v206_v20 }
  0xfa   :  { %v1242_v21 = vpop.eup %1241 }
 0x15e   :  { %v217_v22 = vpop.permute.xlu0 %216 }
 0x15f   :  { %v219_v23 = vmul.f32 %v1242_v21, %v217_v22 }
 0x161   :  { %221 = vrot.lane.b32.xlu1 %v219_v23, %s1305_s10 }
 0x162   :  { %v212_v24 = vpop.permute.xlu0 %211 }
 0x163   :  { %v214_v25 = vmul.f32 %v1242_v21, %v212_v24 }
 0x1d3   :  { %v222_v26 = vpop.permute.xlu1 %221 }
 0x1d4   :  { %v224_v27 = vadd.f32 %v222_v26, %v214_v25  ;;  %v1027_v26 = vld [vmem:[%s1521_s0 + $0xe] sm:$0x3] }
 0x1d5   :  { %42 = vst [vmem:[#allocation4 + $0x6] sm:$0x3] %v1027_v26 }
 0x1d6   :  { %1243 = vtanh.f32 %v224_v27 }
 0x1e0   :  { %v1244_v28 = vpop.eup %1243 }
 0x1e1   :  { %227 = vrot.lane.b32.xlu1 %v1244_v28, %s1304_s9 }
 0x253   :  { %v228_v30 = vpop.permute.xlu1 %227 }
 0x254   :  { %v230_v31 = vmul.f32 %v1242_v21, %v228_v30  ;;  %v554_v30 = vld [vmem:[#allocation4 + $0x6] sm:$0x3] }
 0x256   :  { %232 = vrot.lane.b32.xlu0 %v230_v31, %s1305_s10 }
 0x2c8   :  { %v233_v32 = vpop.permute.xlu0 %232 }
 0x2c9   :  { %1034 = vst.msk [vmem:[%s1525_s4 + $0xe] sm:$0x3] %vm116_vm1, %v233_v32  ;;  %1115 = vmatmul.mubr.msk.f32.vlgmr.msra.gmra.mrb[0].mxu1 %vm128_vm2, %v233_v32 }
 0x2ca   :  { %1203 = vmatpush3.bf16.msra.mxu1 %v1352_v4  ;;  %1136 = vmatprep.mubr.msk.f32.mxu1 %vm1302_vm0, %v1303_v6 }
 0x2cb   :  { %1204 = vmatprep.subr.bf16.mxu1 %v1301_v3 }
 0x2ce   :  { %1206 = vmatpush3.bf16.msra.mxu1 %v1370_v9 }
 0x2cf   :  { %1213 = vmatprep.subr.bf16.mxu1 %v1301_v3 }
 0x39c   :  { %v308_v34 = vpop.f32.mrb[0].mxu1 }
 0x39d   :  { %v312_v35 = vadd.f32 %v308_v34, %v239_v33  ;;  %v1116_v36 = vpop.f32.mrb[1].mxu1 }
 0x39f   :  { %1245 = vtanh.f32 %v312_v35  ;;  %v1036_v38 = vmul.f32 -1.442695, %v312_v35 }
 0x3a1   :  { %1247 = vpow2.f32 %v1036_v38 }
 0x3a9   :  { %v1246_v37 = vpop.eup %1245 }
 0x3aa   :  { %322 = vrot.lane.b32.xlu1 %v1246_v37, %s1304_s9 }
 0x3ab   :  { %v1248_v39 = vpop.eup %1247 }
 0x3ac   :  { %v316_v40 = vadd.f32 1.0, %v1248_v39 }
 0x3ae   :  { %1249 = vrcp.f32 %v316_v40 }
 0x3b8   :  { %v1250_v41 = vpop.eup %1249 }
 0x3b9   :  { %v320_v44 = vmul.f32 %v1250_v41, %v224_v27 }
 0x41c   :  { %v323_v42 = vpop.permute.xlu1 %322 }
 0x41d   :  { %v325_v43 = vmul.f32 %v1250_v41, %v323_v42 }
 0x41f   :  { %327 = vrot.lane.b32.xlu0 %v325_v43, %s1305_s10 }
 0x491   :  { %v328_v45 = vpop.permute.xlu0 %327 }
 0x492   :  { %v330_v46 = vadd.f32 %v328_v45, %v320_v44  ;;  %v1026_v45 = vld [vmem:[%s1521_s0 + $0xa] sm:$0x3] }
 0x493   :  { %40 = vst [vmem:[#allocation4 + $0x4] sm:$0x3] %v1026_v45 }
 0x494   :  { %1251 = vtanh.f32 %v330_v46 }
 0x49e   :  { %v1252_v47 = vpop.eup %1251 }
 0x49f   :  { %333 = vrot.lane.b32.xlu1 %v1252_v47, %s1304_s9 }
 0x511   :  { %v334_v49 = vpop.permute.xlu1 %333 }
 0x512   :  { %v336_v50 = vmul.f32 %v1250_v41, %v334_v49  ;;  %v659_v49 = vld [vmem:[#allocation4 + $0x4] sm:$0x3] }
 0x514   :  { %338 = vrot.lane.b32.xlu0 %v336_v50, %s1305_s10 }
 0x586   :  { %v339_v51 = vpop.permute.xlu0 %338 }
 0x587   :  { %1037 = vst.msk [vmem:[%s1525_s4 + $0xc] sm:$0x3] %vm116_vm1, %v339_v51  ;;  %1126 = vmatmul.mubr.msk.f32.vlgmr.msra.gmra.mrb[2].mxu0 %vm128_vm2, %v339_v51 }
 0x588   :  { %1209 = vmatpush3.bf16.msra.mxu0 %v1352_v4  ;;  %1147 = vmatprep.mubr.msk.f32.mxu0 %vm1302_vm0, %v1303_v6 }
 0x589   :  { %1210 = vmatprep.subr.bf16.mxu0 %v1301_v3 }
 0x58c   :  { %1212 = vmatpush3.bf16.msra.mxu0 %v1370_v9 }
 0x58d   :  { %1219 = vmatprep.subr.bf16.mxu0 %v1301_v3 }
 0x65a   :  { %v413_v53 = vpop.f32.mrb[2].mxu0 }
 0x65b   :  { %v417_v54 = vadd.f32 %v413_v53, %v344_v52  ;;  %v1127_v55 = vpop.f32.mrb[3].mxu0 }
 0x65d   :  { %1253 = vtanh.f32 %v417_v54  ;;  %v1039_v57 = vmul.f32 -1.442695, %v417_v54 }
 0x65f   :  { %1255 = vpow2.f32 %v1039_v57 }
 0x667   :  { %v1254_v56 = vpop.eup %1253 }
 0x668   :  { %427 = vrot.lane.b32.xlu1 %v1254_v56, %s1304_s9 }
 0x669   :  { %v1256_v58 = vpop.eup %1255 }
 0x66a   :  { %v421_v59 = vadd.f32 1.0, %v1256_v58 }
 0x66c   :  { %1257 = vrcp.f32 %v421_v59 }
 0x676   :  { %v1258_v60 = vpop.eup %1257 }
 0x677   :  { %v425_v63 = vmul.f32 %v1258_v60, %v330_v46 }
 0x6da   :  { %v428_v61 = vpop.permute.xlu1 %427 }
 0x6db   :  { %v430_v62 = vmul.f32 %v1258_v60, %v428_v61 }
 0x6dd   :  { %432 = vrot.lane.b32.xlu0 %v430_v62, %s1305_s10 }
 0x74f   :  { %v433_v0 = vpop.permute.xlu0 %432 }
 0x750   :  { %v435_v1 = vadd.f32 %v433_v0, %v425_v63 }
 0x752   :  { %1259 = vtanh.f32 %v435_v1 }
 0x75c   :  { %v1260_v2 = vpop.eup %1259 }
 0x75d   :  { %438 = vrot.lane.b32.xlu1 %v1260_v2, %s1304_s9 }
 0x7cf   :  { %v439_v7 = vpop.permute.xlu1 %438 }
 0x7d0   :  { %v441_v8 = vmul.f32 %v1258_v60, %v439_v7  ;;  %v1025_v60 = vld [vmem:[%s1521_s0 + $0x6] sm:$0x3] }
 0x7d1   :  { %38 = vst [vmem:[#allocation4 + $0x2] sm:$0x3] %v1025_v60 }
 0x7d2   :  { %443 = vrot.lane.b32.xlu0 %v441_v8, %s1305_s10 }
 0x7d8   :  { %v764_v0 = vld [vmem:[#allocation4 + $0x2] sm:$0x3] }
 0x844   :  { %v444_v10 = vpop.permute.xlu0 %443 }
 0x845   :  { %1040 = vst.msk [vmem:[%s1525_s4 + $0xa] sm:$0x3] %vm116_vm1, %v444_v10  ;;  %1137 = vmatmul.mubr.msk.f32.vlgmr.msra.gmra.mrb[2].mxu1 %vm128_vm2, %v444_v10 }
 0x846   :  { %1215 = vmatpush3.bf16.msra.mxu1 %v1352_v4  ;;  %1158 = vmatprep.mubr.msk.f32.mxu1 %vm1302_vm0, %v1303_v6 }
 0x847   :  { %1216 = vmatprep.subr.bf16.mxu1 %v1301_v3 }
 0x84a   :  { %1218 = vmatpush3.bf16.msra.mxu1 %v1370_v9 }
 0x84b   :  { %1225 = vmatprep.subr.bf16.mxu1 %v1301_v3 }
 0x918   :  { %v518_v12 = vpop.f32.mrb[2].mxu1 }
 0x919   :  { %v522_v13 = vadd.f32 %v518_v12, %v449_v11  ;;  %v1138_v14 = vpop.f32.mrb[3].mxu1 }
 0x91b   :  { %1261 = vtanh.f32 %v522_v13  ;;  %v1042_v16 = vmul.f32 -1.442695, %v522_v13 }
 0x91d   :  { %1263 = vpow2.f32 %v1042_v16 }
 0x925   :  { %v1262_v15 = vpop.eup %1261 }
 0x926   :  { %532 = vrot.lane.b32.xlu1 %v1262_v15, %s1304_s9 }
 0x927   :  { %v1264_v17 = vpop.eup %1263 }
 0x928   :  { %v526_v18 = vadd.f32 1.0, %v1264_v17 }
 0x92a   :  { %1265 = vrcp.f32 %v526_v18 }
 0x934   :  { %v1266_v19 = vpop.eup %1265 }
 0x935   :  { %v530_v22 = vmul.f32 %v1266_v19, %v435_v1 }
 0x998   :  { %v533_v20 = vpop.permute.xlu1 %532 }
 0x999   :  { %v535_v21 = vmul.f32 %v1266_v19, %v533_v20 }
 0x99b   :  { %537 = vrot.lane.b32.xlu0 %v535_v21, %s1305_s10 }
 0xa0d   :  { %v538_v23 = vpop.permute.xlu0 %537 }
 0xa0e   :  { %v540_v24 = vadd.f32 %v538_v23, %v530_v22 }
 0xa10   :  { %1267 = vtanh.f32 %v540_v24 }
 0xa1a   :  { %v1268_v25 = vpop.eup %1267 }
 0xa1b   :  { %543 = vrot.lane.b32.xlu1 %v1268_v25, %s1304_s9 }
 0xa8d   :  { %v544_v27 = vpop.permute.xlu1 %543 }
 0xa8e   :  { %v546_v28 = vmul.f32 %v1266_v19, %v544_v27  ;;  %v1024_v19 = vld [vmem:[%s1521_s0 + $0x2] sm:$0x3]  ;;  %s1306_s0 = smov 96  }
 0xa8f   :  { %36 = vst [vmem:[#allocation4] sm:$0x3] %v1024_v19 }
 0xa90   :  { %548 = vrot.lane.b32.xlu0 %v546_v28, %s1305_s10 }
 0xa96   :  { %v868_v23 = vld [vmem:[#allocation4] sm:$0x3] }
 0xb02   :  { %v549_v29 = vpop.permute.xlu0 %548 }
 0xb03   :  { %1043 = vst.msk [vmem:[%s1525_s4 + $0x8] sm:$0x3] %vm116_vm1, %v549_v29  ;;  %1148 = vmatmul.mubr.msk.f32.vlgmr.msra.gmra.mrb[4].mxu0 %vm128_vm2, %v549_v29 }
 0xb04   :  { %1221 = vmatpush3.bf16.msra.mxu0 %v1352_v4  ;;  %1169 = vmatprep.mubr.msk.f32.mxu0 %vm1302_vm0, %v1303_v6 }
 0xb05   :  { %1222 = vmatprep.subr.bf16.mxu0 %v1301_v3 }
 0xb08   :  { %1224 = vmatpush3.bf16.msra.mxu0 %v1370_v9 }
 0xbd6   :  { %v623_v31 = vpop.f32.mrb[4].mxu0 }
 0xbd7   :  { %v627_v32 = vadd.f32 %v623_v31, %v554_v30  ;;  %v1149_v33 = vpop.f32.mrb[5].mxu0 }
 0xbd9   :  { %1269 = vtanh.f32 %v627_v32  ;;  %v1045_v35 = vmul.f32 -1.442695, %v627_v32 }
 0xbdb   :  { %1271 = vpow2.f32 %v1045_v35 }
 0xbe3   :  { %v1270_v34 = vpop.eup %1269 }
 0xbe4   :  { %637 = vrot.lane.b32.xlu1 %v1270_v34, %s1304_s9 }
 0xbe5   :  { %v1272_v36 = vpop.eup %1271 }
 0xbe6   :  { %v631_v37 = vadd.f32 1.0, %v1272_v36 }
 0xbe8   :  { %1273 = vrcp.f32 %v631_v37 }
 0xbf2   :  { %v1274_v38 = vpop.eup %1273 }
 0xbf3   :  { %v635_v41 = vmul.f32 %v1274_v38, %v540_v24 }
 0xc56   :  { %v638_v39 = vpop.permute.xlu1 %637 }
 0xc57   :  { %v640_v40 = vmul.f32 %v1274_v38, %v638_v39 }
 0xc59   :  { %642 = vrot.lane.b32.xlu0 %v640_v40, %s1305_s10 }
 0xccb   :  { %v643_v42 = vpop.permute.xlu0 %642 }
 0xccc   :  { %v645_v43 = vadd.f32 %v643_v42, %v635_v41 }
 0xcce   :  { %1275 = vtanh.f32 %v645_v43 }
 0xcd8   :  { %v1276_v44 = vpop.eup %1275 }
 0xcd9   :  { %648 = vrot.lane.b32.xlu1 %v1276_v44, %s1304_s9 }
 0xd4b   :  { %v649_v46 = vpop.permute.xlu1 %648 }
 0xd4c   :  { %v651_v47 = vmul.f32 %v1274_v38, %v649_v46 }
 0xd4e   :  { %653 = vrot.lane.b32.xlu0 %v651_v47, %s1305_s10 }
 0xdc0   :  { %v654_v48 = vpop.permute.xlu0 %653 }
 0xdc1   :  { %1046 = vst.msk [vmem:[%s1525_s4 + $0x6] sm:$0x3] %vm116_vm1, %v654_v48  ;;  %1159 = vmatmul.mubr.msk.f32.vlgmr.msra.gmra.mrb[4].mxu1 %vm128_vm2, %v654_v48 }
 0xdc2   :  { %1227 = vmatpush3.bf16.msra.mxu1 %v1352_v4  ;;  %1180 = vmatprep.mubr.msk.f32.mxu1 %vm1302_vm0, %v1303_v6 }
 0xdc3   :  { %1228 = vmatprep.subr.bf16.mxu1 %v1301_v3 }
 0xdc6   :  { %1230 = vmatpush3.bf16.msra.mxu1 %v1370_v9 }
 0xe94   :  { %v728_v50 = vpop.f32.mrb[4].mxu1 }
 0xe95   :  { %v732_v51 = vadd.f32 %v728_v50, %v659_v49  ;;  %v1160_v52 = vpop.f32.mrb[5].mxu1 }
 0xe97   :  { %1277 = vtanh.f32 %v732_v51  ;;  %v1048_v54 = vmul.f32 -1.442695, %v732_v51 }
 0xe99   :  { %1279 = vpow2.f32 %v1048_v54 }
 0xea1   :  { %v1278_v53 = vpop.eup %1277 }
 0xea2   :  { %742 = vrot.lane.b32.xlu1 %v1278_v53, %s1304_s9 }
 0xea3   :  { %v1280_v55 = vpop.eup %1279 }
 0xea4   :  { %v736_v56 = vadd.f32 1.0, %v1280_v55 }
 0xea6   :  { %1281 = vrcp.f32 %v736_v56 }
 0xeb0   :  { %v1282_v4 = vpop.eup %1281 }
 0xeb1   :  { %v740_v3 = vmul.f32 %v1282_v4, %v645_v43 }
 0xf14   :  { %v743_v57 = vpop.permute.xlu1 %742 }
 0xf15   :  { %v745_v6 = vmul.f32 %v1282_v4, %v743_v57 }
 0xf17   :  { %747 = vrot.lane.b32.xlu0 %v745_v6, %s1305_s10 }
 0xf89   :  { %v748_v9 = vpop.permute.xlu0 %747 }
 0xf8a   :  { %v750_v58 = vadd.f32 %v748_v9, %v740_v3 }
 0xf8c   :  { %1283 = vtanh.f32 %v750_v58 }
 0xf96   :  { %v1284_v59 = vpop.eup %1283 }
 0xf97   :  { %753 = vrot.lane.b32.xlu1 %v1284_v59, %s1304_s9 }
0x1009   :  { %v754_v61 = vpop.permute.xlu1 %753 }
0x100a   :  { %v756_v62 = vmul.f32 %v1282_v4, %v754_v61 }
0x100c   :  { %758 = vrot.lane.b32.xlu0 %v756_v62, %s1305_s10 }
0x107e   :  { %v759_v63 = vpop.permute.xlu0 %758 }
0x107f   :  { %1049 = vst.msk [vmem:[%s1525_s4 + $0x4] sm:$0x3] %vm116_vm1, %v759_v63  ;;  %1170 = vmatmul.mubr.msk.f32.vlgmr.msra.gmra.mrb[6].mxu0 %vm128_vm2, %v759_v63 }
0x1152   :  { %v833_v1 = vpop.f32.mrb[6].mxu0 }
0x1153   :  { %v837_v2 = vadd.f32 %v833_v1, %v764_v0  ;;  %v1171_v5 = vpop.f32.mrb[7].mxu0 }
0x1155   :  { %1285 = vtanh.f32 %v837_v2  ;;  %v1051_v8 = vmul.f32 -1.442695, %v837_v2 }
0x1157   :  { %1287 = vpow2.f32 %v1051_v8 }
0x115f   :  { %v1286_v7 = vpop.eup %1285 }
0x1160   :  { %847 = vrot.lane.b32.xlu1 %v1286_v7, %s1304_s9 }
0x1161   :  { %v1288_v10 = vpop.eup %1287 }
0x1162   :  { %v841_v11 = vadd.f32 1.0, %v1288_v10 }
0x1164   :  { %1289 = vrcp.f32 %v841_v11 }
0x116e   :  { %v1290_v12 = vpop.eup %1289 }
0x116f   :  { %v845_v15 = vmul.f32 %v1290_v12, %v750_v58 }
0x11d2   :  { %v848_v13 = vpop.permute.xlu1 %847 }
0x11d3   :  { %v850_v14 = vmul.f32 %v1290_v12, %v848_v13 }
0x11d5   :  { %852 = vrot.lane.b32.xlu0 %v850_v14, %s1305_s10 }
0x1247   :  { %v853_v16 = vpop.permute.xlu0 %852 }
0x1248   :  { %v855_v17 = vadd.f32 %v853_v16, %v845_v15 }
0x124a   :  { %1291 = vtanh.f32 %v855_v17 }
0x1254   :  { %v1292_v18 = vpop.eup %1291 }
0x1255   :  { %858 = vrot.lane.b32.xlu1 %v1292_v18, %s1304_s9 }
0x12c7   :  { %v859_v20 = vpop.permute.xlu1 %858 }
0x12c8   :  { %v861_v21 = vmul.f32 %v1290_v12, %v859_v20 }
0x12ca   :  { %863 = vrot.lane.b32.xlu0 %v861_v21, %s1305_s10 }
0x133c   :  { %v864_v22 = vpop.permute.xlu0 %863 }
0x133d   :  { %1052 = vst.msk [vmem:[%s1525_s4 + $0x2] sm:$0x3] %vm116_vm1, %v864_v22  ;;  %1181 = vmatmul.mubr.msk.f32.vlgmr.msra.gmra.mrb[6].mxu1 %vm128_vm2, %v864_v22 }
0x1410   :  { %v937_v24 = vpop.f32.mrb[6].mxu1 }
0x1411   :  { %v941_v25 = vadd.f32 %v937_v24, %v868_v23  ;;  %v1182_v26 = vpop.f32.mrb[7].mxu1 }
0x1413   :  { %1293 = vtanh.f32 %v941_v25  ;;  %v1054_v28 = vmul.f32 -1.442695, %v941_v25 }
0x1415   :  { %1295 = vpow2.f32 %v1054_v28 }
0x141d   :  { %v1294_v27 = vpop.eup %1293 }
0x141e   :  { %951 = vrot.lane.b32.xlu1 %v1294_v27, %s1304_s9 }
0x141f   :  { %v1296_v29 = vpop.eup %1295 }
0x1420   :  { %v945_v30 = vadd.f32 1.0, %v1296_v29 }
0x1422   :  { %1297 = vrcp.f32 %v945_v30 }
0x142c   :  { %v1298_v31 = vpop.eup %1297 }
0x142d   :  { %v949_v34 = vmul.f32 %v1298_v31, %v855_v17 }
0x1490   :  { %v952_v32 = vpop.permute.xlu1 %951 }
0x1491   :  { %v954_v33 = vmul.f32 %v1298_v31, %v952_v32 }
0x1493   :  { %956 = vrot.lane.b32.xlu0 %v954_v33, %s1305_s10 }
0x1505   :  { %v957_v35 = vpop.permute.xlu0 %956 }
0x1506   :  { %v959_v36 = vadd.f32 %v957_v35, %v949_v34 }
0x1508   :  { %1299 = vtanh.f32 %v959_v36 }
0x1512   :  { %v1300_v37 = vpop.eup %1299 }
0x1513   :  { %962 = vrot.lane.b32.xlu1 %v1300_v37, %s1304_s9 }
0x1517   :  { %973 = vrot.lane.b32.xlu1 %v959_v36, %s1306_s0 }
0x1585   :  { %v963_v38 = vpop.permute.xlu1 %962 }
0x1586   :  { %v965_v39 = vmul.f32 %v1298_v31, %v963_v38 }
0x1588   :  { %967 = vrot.lane.b32.xlu0 %v965_v39, %s1305_s10 }
0x1589   :  { %v974_v40 = vpop.permute.xlu1 %973 }
0x158a   :  { %976 = vst.msk [vmem:[#allocation3] sm:$0x3] %vm116_vm1, %v974_v40  ;;  %981 = vst.msk [vmem:[%s1527_s6] sm:$0x3] %vm116_vm1, %v974_v40 }
0x15fa   :  { %v968_v41 = vpop.permute.xlu0 %967 }
0x15fb   :  { %970 = vst.msk [vmem:[%s1525_s4] sm:$0x3] %vm116_vm1, %v968_v41  ;;  %971 = vst.msk [vmem:[#allocation2] sm:$0x3] %vm116_vm1, %v968_v41 }
0x15fc   :  { %980 = vst.msk [vmem:[%s1526_s5] sm:$0x3] %vm116_vm1, %v968_v41 }

// kernel: blstm_forward.8
= control target key start
LH: loop header
LB: loop body
LE: loop exit
PB: predicated region body
PF: predicated region fallthrough
CT: control target
= control target key end

     0   :  { %v1245_v3 = vmov 0.0|0.0   ;;  %vm1246_vm0 = vmmov 0   ;;  %v1247_v6 = vmov 0.0   ;;  %vm94_vm1 = vcmask 254976   ;;  %s1248_s9 = smov 64   ;;  %s1249_s10 = smov 32   ;;  %s1465_s0 = inlined_call_operand.vmem [shape: f32[8,2,256], index: 0, kind: input, shape index: {}]   ;;  %s1466_s1 = inlined_call_operand.vmem [shape: f32[32,128], index: 1, kind: input, shape index: {}]   ;;  %s1467_s2 = inlined_call_operand.vmem [shape: f32[2,32], index: 2, kind: input, shape index: {}, may-alias: {2,3}]   ;;  %s1468_s3 = inlined_call_operand.vmem [shape: f32[2,32], index: 3, kind: input, shape index: {}, may-alias: {2,3}]   ;;  %s1469_s4 = inlined_call_operand.vmem [shape: f32[8,2,32], index: 4, kind: output, shape index: {0}]   ;;  %s1470_s5 = inlined_call_operand.vmem [shape: f32[2,32], index: 5, kind: output, shape index: {1}]   ;;  %s1471_s6 = inlined_call_operand.vmem [shape: f32[2,32], index: 6, kind: output, shape index: {2}]  }
   0x1   :  { %v98_v0 = vld [vmem:[%s1466_s1] sm:$0xff]  ;;  %v99_v1 = vld [vmem:[%s1466_s1 + $0x8] sm:$0xff]  ;;  %v100_v2 = vld [vmem:[%s1466_s1 + $0x10] sm:$0xff]  ;;  %1127 = vmatprep.subr.bf16.mxu0 %v1245_v3  ;;  %1047 = vmatprep.mubr.msk.f32.mxu0 %vm1246_vm0, %v1247_v6  ;;  %vm105_vm2 = vcmask 261120  }
   0x2   :  { %v1296_v4 = vpack.c.bf16 %v99_v1, %v98_v0  ;;  %v101_v5 = vld [vmem:[%s1466_s1 + $0x18] sm:$0xff]  ;;  %v93_v7 = vld [vmem:[%s1467_s2] sm:$0x3]  ;;  %1133 = vmatprep.subr.bf16.mxu1 %v1245_v3  ;;  %1058 = vmatprep.mubr.msk.f32.mxu1 %vm1246_vm0, %v1247_v6  ;;  %v31_v29 = vld [vmem:[%s1465_s0 + $0x4] sm:$0x3] }
   0x3   :  { %95 = vst.msk [vmem:[#allocation2] sm:$0x3] %vm94_vm1, %v93_v7  ;;  %v29_v8 = vld [vmem:[%s1465_s0] sm:$0x3]  ;;  %v1314_v9 = vpack.c.bf16 %v101_v5, %v100_v2  ;;  %32 = vst [vmem:[#allocation4 + $0x2] sm:$0x3] %v31_v29 }
   0x4   :  { %1129 = vmatpush3.bf16.msra.mxu0 %v1296_v4  ;;  %30 = vst [vmem:[#allocation4] sm:$0x3] %v29_v8  ;;  %1135 = vmatpush3.bf16.msra.mxu1 %v1296_v4  ;;  %v96_v11 = vld [vmem:[%s1468_s3] sm:$0x3]  ;;  %v33_v48 = vld [vmem:[%s1465_s0 + $0x8] sm:$0x3] }
   0x5   :  { %1130 = vmatprep.subr.bf16.mxu0 %v1245_v3  ;;  %1136 = vmatprep.subr.bf16.mxu1 %v1245_v3  ;;  %97 = vst.msk [vmem:[#allocation3] sm:$0x3] %vm94_vm1, %v96_v11  ;;  %34 = vst [vmem:[#allocation4 + $0x4] sm:$0x3] %v33_v48  ;;  %v35_v5 = vld [vmem:[%s1465_s0 + $0xc] sm:$0x3] }
   0x6   :  { %36 = vst [vmem:[#allocation4 + $0x6] sm:$0x3] %v35_v5 }
   0x8   :  { %1132 = vmatpush3.bf16.msra.mxu0 %v1314_v9  ;;  %1138 = vmatpush3.bf16.msra.mxu1 %v1314_v9 }
   0x9   :  { %1139 = vmatprep.subr.bf16.mxu0 %v1245_v3  ;;  %1145 = vmatprep.subr.bf16.mxu1 %v1245_v3 }
   0xa   :  { %v102_v10 = vld [vmem:[#allocation2] sm:$0x3]  ;;  %v215_v33 = vld [vmem:[#allocation4 + $0x2] sm:$0x3] }
   0xb   :  { %1048 = vmatmul.mubr.msk.f32.vlgmr.msra.gmra.mrb[0].mxu0 %vm105_vm2, %v102_v10  ;;  %v104_v12 = vld [vmem:[#allocation4] sm:$0x3] }
   0xc   :  { %1141 = vmatpush3.bf16.msra.mxu0 %v1296_v4  ;;  %1069 = vmatprep.mubr.msk.f32.mxu0 %vm1246_vm0, %v1247_v6  ;;  %v103_v17 = vld [vmem:[#allocation3] sm:$0x3]  ;;  %v320_v52 = vld [vmem:[#allocation4 + $0x4] sm:$0x3] }
   0xd   :  { %1142 = vmatprep.subr.bf16.mxu0 %v1245_v3  ;;  %v425_v11 = vld [vmem:[#allocation4 + $0x6] sm:$0x3] }
  0x10   :  { %1144 = vmatpush3.bf16.msra.mxu0 %v1314_v9 }
  0x11   :  { %1151 = vmatprep.subr.bf16.mxu0 %v1245_v3 }
  0xde   :  { %v175_v13 = vpop.f32.mrb[0].mxu0 }
  0xdf   :  { %v179_v14 = vadd.f32 %v175_v13, %v104_v12  ;;  %v1049_v15 = vpop.f32.mrb[1].mxu0 }
  0xe1   :  { %1181 = vtanh.f32 %v179_v14  ;;  %v977_v18 = vmul.f32 -1.442695, %v179_v14 }
  0xe3   :  { %1183 = vpow2.f32 %v977_v18 }
  0xeb   :  { %v1182_v16 = vpop.eup %1181 }
  0xec   :  { %193 = vrot.lane.b32.xlu0 %v1182_v16, %s1248_s9 }
  0xed   :  { %v1184_v19 = vpop.eup %1183 }
  0xee   :  { %v183_v20 = vadd.f32 1.0, %v1184_v19 }
  0xf0   :  { %188 = vrot.lane.b32.xlu0 %v103_v17, %s1249_s10  ;;  %1185 = vrcp.f32 %v183_v20 }
  0xfa   :  { %v1186_v21 = vpop.eup %1185 }
 0x15e   :  { %v194_v22 = vpop.permute.xlu0 %193 }
 0x15f   :  { %v196_v23 = vmul.f32 %v1186_v21, %v194_v22 }
 0x161   :  { %198 = vrot.lane.b32.xlu1 %v196_v23, %s1249_s10 }
 0x162   :  { %v189_v24 = vpop.permute.xlu0 %188 }
 0x163   :  { %v191_v25 = vmul.f32 %v1186_v21, %v189_v24 }
 0x1d3   :  { %v199_v26 = vpop.permute.xlu1 %198 }
 0x1d4   :  { %v201_v27 = vadd.f32 %v199_v26, %v191_v25  ;;  %v37_v26 = vld [vmem:[%s1465_s0 + $0x10] sm:$0x3] }
 0x1d5   :  { %38 = vst [vmem:[#allocation4 + $0x8] sm:$0x3] %v37_v26 }
 0x1d6   :  { %1187 = vtanh.f32 %v201_v27 }
 0x1e0   :  { %v1188_v28 = vpop.eup %1187 }
 0x1e1   :  { %204 = vrot.lane.b32.xlu1 %v1188_v28, %s1248_s9 }
 0x253   :  { %v205_v30 = vpop.permute.xlu1 %204 }
 0x254   :  { %v207_v31 = vmul.f32 %v1186_v21, %v205_v30  ;;  %v530_v30 = vld [vmem:[#allocation4 + $0x8] sm:$0x3] }
 0x256   :  { %209 = vrot.lane.b32.xlu0 %v207_v31, %s1249_s10 }
 0x2c8   :  { %v210_v32 = vpop.permute.xlu0 %209 }
 0x2c9   :  { %213 = vst.msk [vmem:[%s1469_s4] sm:$0x3] %vm94_vm1, %v210_v32  ;;  %1059 = vmatmul.mubr.msk.f32.vlgmr.msra.gmra.mrb[0].mxu1 %vm105_vm2, %v210_v32 }
 0x2ca   :  { %1147 = vmatpush3.bf16.msra.mxu1 %v1296_v4  ;;  %1080 = vmatprep.mubr.msk.f32.mxu1 %vm1246_vm0, %v1247_v6 }
 0x2cb   :  { %1148 = vmatprep.subr.bf16.mxu1 %v1245_v3 }
 0x2ce   :  { %1150 = vmatpush3.bf16.msra.mxu1 %v1314_v9 }
 0x2cf   :  { %1157 = vmatprep.subr.bf16.mxu1 %v1245_v3 }
 0x39c   :  { %v284_v34 = vpop.f32.mrb[0].mxu1 }
 0x39d   :  { %v288_v35 = vadd.f32 %v284_v34, %v215_v33  ;;  %v1060_v36 = vpop.f32.mrb[1].mxu1 }
 0x39f   :  { %1189 = vtanh.f32 %v288_v35  ;;  %v979_v38 = vmul.f32 -1.442695, %v288_v35 }
 0x3a1   :  { %1191 = vpow2.f32 %v979_v38 }
 0x3a9   :  { %v1190_v37 = vpop.eup %1189 }
 0x3aa   :  { %298 = vrot.lane.b32.xlu1 %v1190_v37, %s1248_s9 }
 0x3ab   :  { %v1192_v39 = vpop.eup %1191 }
 0x3ac   :  { %v292_v40 = vadd.f32 1.0, %v1192_v39 }
 0x3ae   :  { %1193 = vrcp.f32 %v292_v40 }
 0x3b8   :  { %v1194_v41 = vpop.eup %1193 }
 0x3b9   :  { %v296_v44 = vmul.f32 %v1194_v41, %v201_v27 }
 0x41c   :  { %v299_v42 = vpop.permute.xlu1 %298 }
 0x41d   :  { %v301_v43 = vmul.f32 %v1194_v41, %v299_v42 }
 0x41f   :  { %303 = vrot.lane.b32.xlu0 %v301_v43, %s1249_s10 }
 0x491   :  { %v304_v45 = vpop.permute.xlu0 %303 }
 0x492   :  { %v306_v46 = vadd.f32 %v304_v45, %v296_v44  ;;  %v39_v45 = vld [vmem:[%s1465_s0 + $0x14] sm:$0x3] }
 0x493   :  { %40 = vst [vmem:[#allocation4 + $0xa] sm:$0x3] %v39_v45 }
 0x494   :  { %1195 = vtanh.f32 %v306_v46 }
 0x49e   :  { %v1196_v47 = vpop.eup %1195 }
 0x49f   :  { %309 = vrot.lane.b32.xlu1 %v1196_v47, %s1248_s9 }
 0x511   :  { %v310_v49 = vpop.permute.xlu1 %309 }
 0x512   :  { %v312_v50 = vmul.f32 %v1194_v41, %v310_v49  ;;  %v635_v49 = vld [vmem:[#allocation4 + $0xa] sm:$0x3] }
 0x514   :  { %314 = vrot.lane.b32.xlu0 %v312_v50, %s1249_s10 }
 0x586   :  { %v315_v51 = vpop.permute.xlu0 %314 }
 0x587   :  { %980 = vst.msk [vmem:[%s1469_s4 + $0x2] sm:$0x3] %vm94_vm1, %v315_v51  ;;  %1070 = vmatmul.mubr.msk.f32.vlgmr.msra.gmra.mrb[2].mxu0 %vm105_vm2, %v315_v51 }
 0x588   :  { %1153 = vmatpush3.bf16.msra.mxu0 %v1296_v4  ;;  %1091 = vmatprep.mubr.msk.f32.mxu0 %vm1246_vm0, %v1247_v6 }
 0x589   :  { %1154 = vmatprep.subr.bf16.mxu0 %v1245_v3 }
 0x58c   :  { %1156 = vmatpush3.bf16.msra.mxu0 %v1314_v9 }
 0x58d   :  { %1163 = vmatprep.subr.bf16.mxu0 %v1245_v3 }
 0x65a   :  { %v389_v53 = vpop.f32.mrb[2].mxu0 }
 0x65b   :  { %v393_v54 = vadd.f32 %v389_v53, %v320_v52  ;;  %v1071_v55 = vpop.f32.mrb[3].mxu0 }
 0x65d   :  { %1197 = vtanh.f32 %v393_v54  ;;  %v982_v57 = vmul.f32 -1.442695, %v393_v54 }
 0x65f   :  { %1199 = vpow2.f32 %v982_v57 }
 0x667   :  { %v1198_v56 = vpop.eup %1197 }
 0x668   :  { %403 = vrot.lane.b32.xlu1 %v1198_v56, %s1248_s9 }
 0x669   :  { %v1200_v58 = vpop.eup %1199 }
 0x66a   :  { %v397_v59 = vadd.f32 1.0, %v1200_v58 }
 0x66c   :  { %1201 = vrcp.f32 %v397_v59 }
 0x676   :  { %v1202_v60 = vpop.eup %1201 }
 0x677   :  { %v401_v63 = vmul.f32 %v1202_v60, %v306_v46 }
 0x6da   :  { %v404_v61 = vpop.permute.xlu1 %403 }
 0x6db   :  { %v406_v62 = vmul.f32 %v1202_v60, %v404_v61 }
 0x6dd   :  { %408 = vrot.lane.b32.xlu0 %v406_v62, %s1249_s10 }
 0x74f   :  { %v409_v0 = vpop.permute.xlu0 %408 }
 0x750   :  { %v411_v1 = vadd.f32 %v409_v0, %v401_v63 }
 0x752   :  { %1203 = vtanh.f32 %v411_v1 }
 0x75c   :  { %v1204_v2 = vpop.eup %1203 }
 0x75d   :  { %414 = vrot.lane.b32.xlu1 %v1204_v2, %s1248_s9 }
 0x7cf   :  { %v415_v7 = vpop.permute.xlu1 %414 }
 0x7d0   :  { %v417_v8 = vmul.f32 %v1202_v60, %v415_v7  ;;  %v41_v60 = vld [vmem:[%s1465_s0 + $0x18] sm:$0x3] }
 0x7d1   :  { %42 = vst [vmem:[#allocation4 + $0xc] sm:$0x3] %v41_v60 }
 0x7d2   :  { %419 = vrot.lane.b32.xlu0 %v417_v8, %s1249_s10 }
 0x7d8   :  { %v740_v0 = vld [vmem:[#allocation4 + $0xc] sm:$0x3] }
 0x844   :  { %v420_v10 = vpop.permute.xlu0 %419 }
 0x845   :  { %983 = vst.msk [vmem:[%s1469_s4 + $0x4] sm:$0x3] %vm94_vm1, %v420_v10  ;;  %1081 = vmatmul.mubr.msk.f32.vlgmr.msra.gmra.mrb[2].mxu1 %vm105_vm2, %v420_v10 }
 0x846   :  { %1159 = vmatpush3.bf16.msra.mxu1 %v1296_v4  ;;  %1102 = vmatprep.mubr.msk.f32.mxu1 %vm1246_vm0, %v1247_v6 }
 0x847   :  { %1160 = vmatprep.subr.bf16.mxu1 %v1245_v3 }
 0x84a   :  { %1162 = vmatpush3.bf16.msra.mxu1 %v1314_v9 }
 0x84b   :  { %1169 = vmatprep.subr.bf16.mxu1 %v1245_v3 }
 0x918   :  { %v494_v12 = vpop.f32.mrb[2].mxu1 }
 0x919   :  { %v498_v13 = vadd.f32 %v494_v12, %v425_v11  ;;  %v1082_v14 = vpop.f32.mrb[3].mxu1 }
 0x91b   :  { %1205 = vtanh.f32 %v498_v13  ;;  %v985_v16 = vmul.f32 -1.442695, %v498_v13 }
 0x91d   :  { %1207 = vpow2.f32 %v985_v16 }
 0x925   :  { %v1206_v15 = vpop.eup %1205 }
 0x926   :  { %508 = vrot.lane.b32.xlu1 %v1206_v15, %s1248_s9 }
 0x927   :  { %v1208_v17 = vpop.eup %1207 }
 0x928   :  { %v502_v18 = vadd.f32 1.0, %v1208_v17 }
 0x92a   :  { %1209 = vrcp.f32 %v502_v18 }
 0x934   :  { %v1210_v19 = vpop.eup %1209 }
 0x935   :  { %v506_v22 = vmul.f32 %v1210_v19, %v411_v1 }
 0x998   :  { %v509_v20 = vpop.permute.xlu1 %508 }
 0x999   :  { %v511_v21 = vmul.f32 %v1210_v19, %v509_v20 }
 0x99b   :  { %513 = vrot.lane.b32.xlu0 %v511_v21, %s1249_s10 }
 0xa0d   :  { %v514_v23 = vpop.permute.xlu0 %513 }
 0xa0e   :  { %v516_v24 = vadd.f32 %v514_v23, %v506_v22 }
 0xa10   :  { %1211 = vtanh.f32 %v516_v24 }
 0xa1a   :  { %v1212_v25 = vpop.eup %1211 }
 0xa1b   :  { %519 = vrot.lane.b32.xlu1 %v1212_v25, %s1248_s9 }
 0xa8d   :  { %v520_v27 = vpop.permute.xlu1 %519 }
 0xa8e   :  { %v522_v28 = vmul.f32 %v1210_v19, %v520_v27  ;;  %v43_v19 = vld [vmem:[%s1465_s0 + $0x1c] sm:$0x3]  ;;  %s1250_s0 = smov 96  }
 0xa8f   :  { %44 = vst [vmem:[#allocation4 + $0xe] sm:$0x3] %v43_v19 }
 0xa90   :  { %524 = vrot.lane.b32.xlu0 %v522_v28, %s1249_s10 }
 0xa96   :  { %v845_v23 = vld [vmem:[#allocation4 + $0xe] sm:$0x3] }
 0xb02   :  { %v525_v29 = vpop.permute.xlu0 %524 }
 0xb03   :  { %986 = vst.msk [vmem:[%s1469_s4 + $0x6] sm:$0x3] %vm94_vm1, %v525_v29  ;;  %1092 = vmatmul.mubr.msk.f32.vlgmr.msra.gmra.mrb[4].mxu0 %vm105_vm2, %v525_v29 }
 0xb04   :  { %1165 = vmatpush3.bf16.msra.mxu0 %v1296_v4  ;;  %1113 = vmatprep.mubr.msk.f32.mxu0 %vm1246_vm0, %v1247_v6 }
 0xb05   :  { %1166 = vmatprep.subr.bf16.mxu0 %v1245_v3 }
 0xb08   :  { %1168 = vmatpush3.bf16.msra.mxu0 %v1314_v9 }
 0xbd6   :  { %v599_v31 = vpop.f32.mrb[4].mxu0 }
 0xbd7   :  { %v603_v32 = vadd.f32 %v599_v31, %v530_v30  ;;  %v1093_v33 = vpop.f32.mrb[5].mxu0 }
 0xbd9   :  { %1213 = vtanh.f32 %v603_v32  ;;  %v988_v35 = vmul.f32 -1.442695, %v603_v32 }
 0xbdb   :  { %1215 = vpow2.f32 %v988_v35 }
 0xbe3   :  { %v1214_v34 = vpop.eup %1213 }
 0xbe4   :  { %613 = vrot.lane.b32.xlu1 %v1214_v34, %s1248_s9 }
 0xbe5   :  { %v1216_v36 = vpop.eup %1215 }
 0xbe6   :  { %v607_v37 = vadd.f32 1.0, %v1216_v36 }
 0xbe8   :  { %1217 = vrcp.f32 %v607_v37 }
 0xbf2   :  { %v1218_v38 = vpop.eup %1217 }
 0xbf3   :  { %v611_v41 = vmul.f32 %v1218_v38, %v516_v24 }
 0xc56   :  { %v614_v39 = vpop.permute.xlu1 %613 }
 0xc57   :  { %v616_v40 = vmul.f32 %v1218_v38, %v614_v39 }
 0xc59   :  { %618 = vrot.lane.b32.xlu0 %v616_v40, %s1249_s10 }
 0xccb   :  { %v619_v42 = vpop.permute.xlu0 %618 }
 0xccc   :  { %v621_v43 = vadd.f32 %v619_v42, %v611_v41 }
 0xcce   :  { %1219 = vtanh.f32 %v621_v43 }
 0xcd8   :  { %v1220_v44 = vpop.eup %1219 }
 0xcd9   :  { %624 = vrot.lane.b32.xlu1 %v1220_v44, %s1248_s9 }
 0xd4b   :  { %v625_v46 = vpop.permute.xlu1 %624 }
 0xd4c   :  { %v627_v47 = vmul.f32 %v1218_v38, %v625_v46 }
 0xd4e   :  { %629 = vrot.lane.b32.xlu0 %v627_v47, %s1249_s10 }
 0xdc0   :  { %v630_v48 = vpop.permute.xlu0 %629 }
 0xdc1   :  { %989 = vst.msk [vmem:[%s1469_s4 + $0x8] sm:$0x3] %vm94_vm1, %v630_v48  ;;  %1103 = vmatmul.mubr.msk.f32.vlgmr.msra.gmra.mrb[4].mxu1 %vm105_vm2, %v630_v48 }
 0xdc2   :  { %1171 = vmatpush3.bf16.msra.mxu1 %v1296_v4  ;;  %1124 = vmatprep.mubr.msk.f32.mxu1 %vm1246_vm0, %v1247_v6 }
 0xdc3   :  { %1172 = vmatprep.subr.bf16.mxu1 %v1245_v3 }
 0xdc6   :  { %1174 = vmatpush3.bf16.msra.mxu1 %v1314_v9 }
 0xe94   :  { %v704_v50 = vpop.f32.mrb[4].mxu1 }
 0xe95   :  { %v708_v51 = vadd.f32 %v704_v50, %v635_v49  ;;  %v1104_v52 = vpop.f32.mrb[5].mxu1 }
 0xe97   :  { %1221 = vtanh.f32 %v708_v51  ;;  %v991_v54 = vmul.f32 -1.442695, %v708_v51 }
 0xe99   :  { %1223 = vpow2.f32 %v991_v54 }
 0xea1   :  { %v1222_v53 = vpop.eup %1221 }
 0xea2   :  { %718 = vrot.lane.b32.xlu1 %v1222_v53, %s1248_s9 }
 0xea3   :  { %v1224_v55 = vpop.eup %1223 }
 0xea4   :  { %v712_v56 = vadd.f32 1.0, %v1224_v55 }
 0xea6   :  { %1225 = vrcp.f32 %v712_v56 }
 0xeb0   :  { %v1226_v4 = vpop.eup %1225 }
 0xeb1   :  { %v716_v3 = vmul.f32 %v1226_v4, %v621_v43 }
 0xf14   :  { %v719_v57 = vpop.permute.xlu1 %718 }
 0xf15   :  { %v721_v6 = vmul.f32 %v1226_v4, %v719_v57 }
 0xf17   :  { %723 = vrot.lane.b32.xlu0 %v721_v6, %s1249_s10 }
 0xf89   :  { %v724_v9 = vpop.permute.xlu0 %723 }
 0xf8a   :  { %v726_v58 = vadd.f32 %v724_v9, %v716_v3 }
 0xf8c   :  { %1227 = vtanh.f32 %v726_v58 }
 0xf96   :  { %v1228_v59 = vpop.eup %1227 }
 0xf97   :  { %729 = vrot.lane.b32.xlu1 %v1228_v59, %s1248_s9 }
0x1009   :  { %v730_v61 = vpop.permute.xlu1 %729 }
0x100a   :  { %v732_v62 = vmul.f32 %v1226_v4, %v730_v61 }
0x100c   :  { %734 = vrot.lane.b32.xlu0 %v732_v62, %s1249_s10 }
0x107e   :  { %v735_v63 = vpop.permute.xlu0 %734 }
0x107f   :  { %992 = vst.msk [vmem:[%s1469_s4 + $0xa] sm:$0x3] %vm94_vm1, %v735_v63  ;;  %1114 = vmatmul.mubr.msk.f32.vlgmr.msra.gmra.mrb[6].mxu0 %vm105_vm2, %v735_v63 }
0x1152   :  { %v809_v1 = vpop.f32.mrb[6].mxu0 }
0x1153   :  { %v813_v2 = vadd.f32 %v809_v1, %v740_v0  ;;  %v1115_v5 = vpop.f32.mrb[7].mxu0 }
0x1155   :  { %1229 = vtanh.f32 %v813_v2  ;;  %v994_v8 = vmul.f32 -1.442695, %v813_v2 }
0x1157   :  { %1231 = vpow2.f32 %v994_v8 }
0x115f   :  { %v1230_v7 = vpop.eup %1229 }
0x1160   :  { %823 = vrot.lane.b32.xlu1 %v1230_v7, %s1248_s9 }
0x1161   :  { %v1232_v10 = vpop.eup %1231 }
0x1162   :  { %v817_v11 = vadd.f32 1.0, %v1232_v10 }
0x1164   :  { %1233 = vrcp.f32 %v817_v11 }
0x116e   :  { %v1234_v12 = vpop.eup %1233 }
0x116f   :  { %v821_v15 = vmul.f32 %v1234_v12, %v726_v58 }
0x11d2   :  { %v824_v13 = vpop.permute.xlu1 %823 }
0x11d3   :  { %v826_v14 = vmul.f32 %v1234_v12, %v824_v13 }
0x11d5   :  { %828 = vrot.lane.b32.xlu0 %v826_v14, %s1249_s10 }
0x1247   :  { %v829_v16 = vpop.permute.xlu0 %828 }
0x1248   :  { %v831_v17 = vadd.f32 %v829_v16, %v821_v15 }
0x124a   :  { %1235 = vtanh.f32 %v831_v17 }
0x1254   :  { %v1236_v18 = vpop.eup %1235 }
0x1255   :  { %834 = vrot.lane.b32.xlu1 %v1236_v18, %s1248_s9 }
0x12c7   :  { %v835_v20 = vpop.permute.xlu1 %834 }
0x12c8   :  { %v837_v21 = vmul.f32 %v1234_v12, %v835_v20 }
0x12ca   :  { %839 = vrot.lane.b32.xlu0 %v837_v21, %s1249_s10 }
0x133c   :  { %v840_v22 = vpop.permute.xlu0 %839 }
0x133d   :  { %995 = vst.msk [vmem:[%s1469_s4 + $0xc] sm:$0x3] %vm94_vm1, %v840_v22  ;;  %1125 = vmatmul.mubr.msk.f32.vlgmr.msra.gmra.mrb[6].mxu1 %vm105_vm2, %v840_v22 }
0x1410   :  { %v914_v24 = vpop.f32.mrb[6].mxu1 }
0x1411   :  { %v918_v25 = vadd.f32 %v914_v24, %v845_v23  ;;  %v1126_v26 = vpop.f32.mrb[7].mxu1 }
0x1413   :  { %1237 = vtanh.f32 %v918_v25  ;;  %v997_v28 = vmul.f32 -1.442695, %v918_v25 }
0x1415   :  { %1239 = vpow2.f32 %v997_v28 }
0x141d   :  { %v1238_v27 = vpop.eup %1237 }
0x141e   :  { %928 = vrot.lane.b32.xlu1 %v1238_v27, %s1248_s9 }
0x141f   :  { %v1240_v29 = vpop.eup %1239 }
0x1420   :  { %v922_v30 = vadd.f32 1.0, %v1240_v29 }
0x1422   :  { %1241 = vrcp.f32 %v922_v30 }
0x142c   :  { %v1242_v31 = vpop.eup %1241 }
0x142d   :  { %v926_v34 = vmul.f32 %v1242_v31, %v831_v17 }
0x1490   :  { %v929_v32 = vpop.permute.xlu1 %928 }
0x1491   :  { %v931_v33 = vmul.f32 %v1242_v31, %v929_v32 }
0x1493   :  { %933 = vrot.lane.b32.xlu0 %v931_v33, %s1249_s10 }
0x1505   :  { %v934_v35 = vpop.permute.xlu0 %933 }
0x1506   :  { %v936_v36 = vadd.f32 %v934_v35, %v926_v34 }
0x1508   :  { %1243 = vtanh.f32 %v936_v36 }
0x1512   :  { %v1244_v37 = vpop.eup %1243 }
0x1513   :  { %939 = vrot.lane.b32.xlu1 %v1244_v37, %s1248_s9 }
0x1517   :  { %951 = vrot.lane.b32.xlu1 %v936_v36, %s1250_s0 }
0x1585   :  { %v940_v38 = vpop.permute.xlu1 %939 }
0x1586   :  { %v942_v39 = vmul.f32 %v1242_v31, %v940_v38 }
0x1588   :  { %944 = vrot.lane.b32.xlu0 %v942_v39, %s1249_s10 }
0x1589   :  { %v952_v40 = vpop.permute.xlu1 %951 }
0x158a   :  { %954 = vst.msk [vmem:[#allocation3] sm:$0x3] %vm94_vm1, %v952_v40  ;;  %959 = vst.msk [vmem:[%s1471_s6] sm:$0x3] %vm94_vm1, %v952_v40 }
0x15fa   :  { %v945_v41 = vpop.permute.xlu0 %944 }
0x15fb   :  { %998 = vst.msk [vmem:[%s1469_s4 + $0xe] sm:$0x3] %vm94_vm1, %v945_v41  ;;  %949 = vst.msk [vmem:[#allocation2] sm:$0x3] %vm94_vm1, %v945_v41 }
0x15fc   :  { %958 = vst.msk [vmem:[%s1470_s5] sm:$0x3] %vm94_vm1, %v945_v41 }

// kernel: blstm_forward.13
= control target key start
LH: loop header
LB: loop body
LE: loop exit
PB: predicated region body
PF: predicated region fallthrough
CT: control target
= control target key end

     0   :  { %vm32_vm0 = vcmask 523264   ;;  %s278_s0 = inlined_call_operand.vmem [shape: f32[16,64], index: 0, kind: input, shape index: {}]   ;;  %s279_s1 = inlined_call_operand.vmem [shape: f32[64,32], index: 1, kind: input, shape index: {}]   ;;  %s280_s2 = inlined_call_operand.vmem [shape: f32[1,32], index: 2, kind: input, shape index: {}]   ;;  %s281_s3 = inlined_call_operand.hbm [shape: f32[16,32], index: 3, kind: output, shape index: {}]  }
   0x1   :  { %v17_v0 = vld [vmem:[%s279_s1] sm:$0xff]  ;;  %v18_v1 = vld [vmem:[%s279_s1 + $0x8] sm:$0xff]  ;;  %v19_v2 = vld [vmem:[%s279_s1 + $0x10] sm:$0xff] }
   0x2   :  { %v165_v3 = vpack.c.bf16 %v18_v1, %v17_v0  ;;  %v20_v4 = vld [vmem:[%s279_s1 + $0x18] sm:$0xff]  ;;  %v21_v6 = vld [vmem:[%s279_s1 + $0x20] sm:$0xff]  ;;  %v22_v7 = vld [vmem:[%s279_s1 + $0x28] sm:$0xff] }
   0x3   :  { %v169_v5 = vpack.c.bf16 %v20_v4, %v19_v2  ;;  %v15_v8 = vld [vmem:[%s278_s0] sm:$0xff] }
   0x4   :  { %166 = vmatprep.subr.bf16.mxu0 %v165_v3  ;;  %162 = vmatprep.mubr.msk.f32.mxu0 %vm32_vm0, %v15_v8 }
   0x5   :  { %8 = vsyncpa [#allocation3], 0  ;;  %168 = vmatpush3.bf16.msra.mxu0 %v165_v3  ;;  %v173_v9 = vpack.c.bf16 %v22_v7, %v21_v6  ;;  %v23_v10 = vld [vmem:[%s279_s1 + $0x30] sm:$0xff]  ;;  %v24_v11 = vld [vmem:[%s279_s1 + $0x38] sm:$0xff]  ;;  %s208_s7 = smov [#allocation2]   ;;  %vm114_vm1 = vcmask 261120  }
   0x6   :  { %170 = vmatprep.subr.bf16.mxu0 %v169_v5  ;;  %v177_v12 = vpack.c.bf16 %v24_v11, %v23_v10  ;;  %v16_v13 = vld [vmem:[%s278_s0 + $0x8] sm:$0xff]  ;;  %v133_v14 = vld [vmem:[%s280_s2] ss:$0 sm:$0xff]  ;;  %s122_s8 = sshll.u32 %s208_s7, 4  ;;  %s123_s8 = int_to_ptr.vmem [resolvable:$true] %s122_s8 }
   0x7   :  { %s184_s1 = scalar_lea.vmem %s123_s8, 256  ;;  %p189_p1 = scmp.lt.s32.totalorder %s123_s8, %s123_s8 }
   0x8   :  { %p185_p0 = scmp.ne.s32.totalorder %s123_s8, %s184_s1  ;;  %p190_p2 = scmp.lt.s32.totalorder %s184_s1, %s184_s1 }
   0x9   :  { %172 = vmatpush3.bf16.msra.mxu0 %v169_v5 }
   0xa   :  { %174 = vmatprep.subr.bf16.mxu0 %v173_v9  ;;  %p191_p3 = por %p190_p2, %p189_p1 }
   0xc   :  { %p192_p4 = pnand %p191_p3, %p185_p0 }
   0xd   :  { %176 = vmatpush3.bf16.msra.mxu0 %v173_v9 }
   0xe   :  { %178 = vmatprep.subr.bf16.mxu0 %v177_v12 }
  0x11   :  { %180 = vmatpush3.bf16.msra.mxu0 %v177_v12 }
  0x14   :  { %163 = vmatmul.mubr.msk.f32.vlgmr.msra.gmra.mrb[0].mxu0 %vm32_vm0, %v16_v13 }
  0xe7   :  { %v164_v15 = vpop.f32.mrb[0].mxu0 }
  0xe8   :  { %v111_v16 = vadd.f32 %v164_v15, %v133_v14  ;;  %v105_v17 = vpop.f32.mrb[1].mxu0 }
  0xe9   :  { %v106_v18 = vadd.f32 %v133_v14, %v105_v17 }
  0xea   :  { %116 = vst.msk [vmem:[#allocation2 + $0x8] sm:$0xff] %vm114_vm1, %v111_v16 }
  0xeb   :  { %115 = vst.msk [vmem:[#allocation2] sm:$0xff] %vm114_vm1, %v106_v18 }
  0xec   :  { %195 = shalt.err (!%p192_p4)
}
  0xed   :  { %s196_s2 = scalar_lea.hbm %s281_s3, 256 }
  0xee   :  { %p197_p5 = scmp.ne.s32.totalorder %s281_s3, %s196_s2  ;;  %p200_p6 = scmp.lt.u32.totalorder %s196_s2, %s281_s3 }
  0xf0   :  { %p202_p7 = pnand %p200_p6, %p197_p5 }
  0xf2   :  { %205 = shalt.err (!%p202_p7)
}
  0xf3   :  { %s209_s14 = smov 128   ;;  %s210_s15 = smov 8  }
  0xf4   :  { %128 = dma.vmem_to_hbm [thread:$0]  %s123_s8, 256, %s281_s3, [#allocation3], %s209_s14, %s209_s14, %s210_s15  }
  0xf5   :  { %206 = dma.done.wait [#allocation3], 256  }
  0xf6   :  { %207 = vsyncadd [#allocation3], 4294967040 }
  0xf7   :  { %132 = vsyncpa [#allocation3], 1 }

</bundles_post_ra>
